<compile_context>
chip_gen: v7x
topology: tpu7x:2x2x1
jax: 0.10.0
libtpu: 0.0.40
codegen_flags: <defaults>
</compile_context>

<pallas_src>
import functools

import jax
import jax.numpy as jnp
from jax import lax
from jax.experimental import pallas as pl
from jax.experimental.pallas import tpu as pltpu

LANE = 128


def _round_up(n, m):
    return (n + m - 1) // m * m


def _hw_defaults():
    """(vmem_limit_bytes, target rows per pass-1 tile) for the local TPU gen."""
    try:
        cap = int(pltpu.get_tpu_info().vmem_capacity_bytes)
    except Exception:  # interpret mode / API drift: fall back conservatively
        cap = 64 * 1024 * 1024
    if cap >= 96 * 1024 * 1024:          # v5e / v6e (128 MiB physical VMEM)
        return min(cap * 3 // 4, 100 * 1024 * 1024), 1024
    return min(cap * 7 // 10, 44 * 1024 * 1024), 512   # v7x (64 MiB per TC)


# ----------------------------------------------------------------------------
# Pass 1 kernels: conv + per-(image, Ho-tile) partial BN statistics
# ----------------------------------------------------------------------------
def _conv_stats_kernel(x_ref, w_ref, y_ref, stats_ref, slab_ref, *,
                       tho, wo, stride, kh_sz, kw_sz, cin_p, ho_valid):
    """One (batch, Ho-tile, Cout-tile) grid step: im2col + single MXU matmul."""
    t = pl.program_id(1)
    j = pl.program_id(2)
    rows = tho * wo
    h0 = t * (tho * stride)          # first padded input row of this Ho tile

    # Build the im2col slab once per (n, t); reused across the Cout-tile axis.
    # Each tap's channel stripe is Cin_p (multiple of 128) wide -> full-width,
    # lane-aligned stores (no masked vst / XLU rotation).
    @pl.when(j == 0)
    def _build_slab():
        for kh in range(kh_sz):
            for kw in range(kw_sz):
                if stride == 1:
                    tap = x_ref[0, pl.ds(h0 + kh, tho), kw:kw + wo, :]
                else:
                    tap = x_ref[0, pl.ds(h0 + kh, tho, stride=stride),
                                pl.ds(kw, wo, stride=stride), :]
                c0 = (kh * kw_sz + kw) * cin_p
                slab_ref[:, c0:c0 + cin_p] = tap.reshape(rows, cin_p)

    # Single MXU matmul: bf16 inputs, f32 accumulation, lane-dense Cout tile.
    acc = jnp.dot(slab_ref[...], w_ref[...], preferred_element_type=jnp.float32)

    # bf16 writeback (halves pass-1 write + pass-2 read HBM traffic).
    y_ref[...] = acc.reshape(1, tho, wo, acc.shape[-1]).astype(y_ref.dtype)

    # Per-tile partial statistics (from the f32 accumulator).  Rows belonging to
    # the padded tail of the final Ho tile are masked out (static no-op when the
    # tile size divides Ho).
    if ho_valid % tho != 0:
        lim = (ho_valid - t * tho) * wo
        rid = lax.broadcasted_iota(jnp.int32, (rows, 1), 0)
        acc = jnp.where(rid < lim, acc, 0.0)
    stats_ref[0, 0, 0:1, :] = jnp.sum(acc, axis=0, keepdims=True)
    stats_ref[0, 0, 1:2, :] = jnp.sum(acc * acc, axis=0, keepdims=True)


def _dwconv_stats_kernel(x_ref, w_ref, y_ref, stats_ref, *,
                         tho, wo, stride, kh_sz, kw_sz, sub_tho, ho_valid):
    """Depthwise conv: VPU broadcast-FMA over row sub-chunks (bounded vregs)."""
    t = pl.program_id(1)
    cp = y_ref.shape[-1]
    n_sub = tho // sub_tho
    sub_rows = sub_tho * wo

    # Per-(n, t) partial statistics -> no cross-tile residency, both grid axes
    # can be "parallel".
    stats_ref[...] = jnp.zeros_like(stats_ref)

    def chunk(i):
        ho0 = t * tho + i * sub_tho               # first output row of chunk
        h0 = ho0 * stride
        acc = jnp.zeros((sub_tho, wo, cp), jnp.float32)
        for kh in range(kh_sz):
            for kw in range(kw_sz):
                if stride == 1:
                    tap = x_ref[0, pl.ds(h0 + kh, sub_tho), kw:kw + wo, :]
                else:
                    tap = x_ref[0, pl.ds(h0 + kh, sub_tho, stride=stride),
                                pl.ds(kw, wo, stride=stride), :]
                acc = acc + (tap.astype(jnp.float32)
                             * w_ref[kh, kw:kw + 1, :].astype(jnp.float32))
        y_ref[0, pl.ds(i * sub_tho, sub_tho), :, :] = acc.astype(y_ref.dtype)

        flat = acc.reshape(sub_rows, cp)
        if ho_valid % tho != 0:
            lim = (ho_valid - ho0) * wo
            rid = lax.broadcasted_iota(jnp.int32, (sub_rows, 1), 0)
            flat = jnp.where(rid < lim, flat, 0.0)
        stats_ref[0, 0, 0:1, :] += jnp.sum(flat, axis=0, keepdims=True)
        stats_ref[0, 0, 1:2, :] += jnp.sum(flat * flat, axis=0, keepdims=True)

    if n_sub == 1:
        chunk(0)
    else:
        def _body(i, carry):
            chunk(i)
            return carry
        lax.fori_loop(0, n_sub, _body, 0)


# ----------------------------------------------------------------------------
# Pass 2 kernel: folded BN affine + SiLU (lane-dense elementwise)
# ----------------------------------------------------------------------------
def _bn_silu_kernel(y_ref, scale_ref, shift_ref, o_ref):
    z = y_ref[...].astype(jnp.float32) * scale_ref[...] + shift_ref[...]
    o_ref[...] = (z * jax.nn.sigmoid(z)).astype(o_ref.dtype)


# ----------------------------------------------------------------------------
# Wrapper
# ----------------------------------------------------------------------------
def conv_block(x_nchw, weight_oihw, conv_bias, gamma, beta, *,
               stride, padding, groups=1, eps=1e-5,
               mxu_dtype=jnp.bfloat16, y_dtype=jnp.bfloat16,
               out_dtype=jnp.float32,
               target_block_rows=None, vmem_limit_bytes=None,
               pass2_target_bytes=4 * 1024 * 1024,
               channels_last_out=False):
    """ConvBlock forward (Conv2d + train-mode BatchNorm2d + SiLU), NCHW in/out.

    `conv_bias` is accepted for nn.Conv2d API parity but NOT applied: a
    per-channel constant added before train-mode BatchNorm cancels exactly in
    the returned output (the batch mean shifts by the same constant).
    """
    del conv_bias  # mathematically redundant for the returned forward value
    N, Cin, H, W = x_nchw.shape
    Cout, Cin_g, KH, KW = weight_oihw.shape
    assert Cin_g * groups == Cin and Cout % groups == 0

    hw_vmem, hw_rows = _hw_defaults()
    if vmem_limit_bytes is None:
        vmem_limit_bytes = hw_vmem
    if target_block_rows is None:
        target_block_rows = hw_rows

    Ho = (H + 2 * padding - KH) // stride + 1
    Wo = (W + 2 * padding - KW) // stride + 1
    Hp, Wp = H + 2 * padding, W + 2 * padding
    Cout_p = _round_up(Cout, LANE)
    Cin_p = _round_up(Cin, LANE)
    depthwise = (groups == Cin) and (Cin_g == 1) and (Cout == Cin)

    # Cout tile width: 256 matches the v6e/v7x MXU; depthwise keeps full width.
    if depthwise:
        tn = Cout_p
    else:
        tn = 256 if Cout_p % 256 == 0 else LANE
    kdim_p = KH * KW * Cin_p

    # ---- Ho-tile selection with a per-step VMEM footprint check -------------
    def _derive(tho_):
        n_t_ = (Ho + tho_ - 1) // tho_
        ho_pad_ = n_t_ * tho_
        hpp_ = Hp + max(0, (ho_pad_ - 1) * stride + KH - Hp)
        return n_t_, ho_pad_, hpp_

    def _footprint(tho_):
        _, _, hpp_ = _derive(tho_)
        rows_ = tho_ * Wo
        x_blk = hpp_ * Wp * Cin_p * 2            # bf16 full padded image block
        y_blk = rows_ * tn * 2
        if depthwise:
            w_blk = KH * KW * Cout_p * 2
            slab = 0
            tmp = min(rows_, 128) * Cout_p * 4   # bounded sub-chunk accumulator
        else:
            w_blk = kdim_p * tn * 2
            slab = rows_ * kdim_p * 2
            tmp = rows_ * tn * 4                 # f32 matmul result
        return 2 * x_blk + 2 * y_blk + 2 * w_blk + slab + tmp + (1 << 20)

    tho = max(1, min(Ho, target_block_rows // max(Wo, 1)))
    while tho > 1 and _footprint(tho) > vmem_limit_bytes * 4 // 5:
        tho = max(1, tho // 2)
    n_t, Ho_pad, Hpp = _derive(tho)
    extra_h = Hpp - Hp

    # ---- layout glue: NCHW -> NHWC, spatial zero-pad (+ extra bottom rows for
    # the padded final Ho tile), channel pad to a lane-aligned Cin ------------
    x = jnp.transpose(x_nchw, (0, 2, 3, 1))
    x = jnp.pad(x, ((0, 0), (padding, padding + extra_h),
                    (padding, padding), (0, Cin_p - Cin))).astype(mxu_dtype)

    if depthwise:
        # (KH, KW, Cout_p) bf16 weight; VPU broadcast-FMA path.
        w_arg = jnp.pad(jnp.transpose(weight_oihw[:, 0, :, :], (1, 2, 0)),
                        ((0, 0), (0, 0), (0, Cout_p - Cout))).astype(mxu_dtype)
        sub_cap = max(8, 16384 // Cout_p)        # ~64 KiB live f32 accumulator
        sub_tho = 1
        for d in range(1, tho + 1):
            if tho % d == 0 and d * Wo <= max(Wo, sub_cap):
                sub_tho = d
        kernel = functools.partial(
            _dwconv_stats_kernel, tho=tho, wo=Wo, stride=stride,
            kh_sz=KH, kw_sz=KW, sub_tho=sub_tho, ho_valid=Ho)
        y, stats = pl.pallas_call(
            kernel,
            grid=(N, n_t),
            in_specs=[
                pl.BlockSpec((1, Hpp, Wp, Cin_p), lambda n, t: (n, 0, 0, 0)),
                pl.BlockSpec((KH, KW, Cout_p), lambda n, t: (0, 0, 0)),
            ],
            out_specs=[
                pl.BlockSpec((1, tho, Wo, Cout_p), lambda n, t: (n, t, 0, 0)),
                pl.BlockSpec((1, 1, 2, Cout_p), lambda n, t: (n, t, 0, 0)),
            ],
            out_shape=[
                jax.ShapeDtypeStruct((N, Ho_pad, Wo, Cout_p), y_dtype),
                jax.ShapeDtypeStruct((N, n_t, 2, Cout_p), jnp.float32),
            ],
            compiler_params=pltpu.CompilerParams(
                dimension_semantics=("parallel", "parallel"),
                vmem_limit_bytes=vmem_limit_bytes),
        )(x, w_arg)
    else:
        w_hwio = jnp.transpose(weight_oihw, (2, 3, 1, 0)).astype(jnp.float32)
        if groups == 1:
            w_full = w_hwio
        else:
            # Grouped conv -> block-diagonal dense weight: keeps one MXU matmul.
            cout_g = Cout // groups
            w_full = jnp.zeros((KH, KW, Cin, Cout), jnp.float32)
            for g in range(groups):
                w_full = w_full.at[:, :, g * Cin_g:(g + 1) * Cin_g,
                                   g * cout_g:(g + 1) * cout_g].set(
                    w_hwio[:, :, :, g * cout_g:(g + 1) * cout_g])
        # Channel-pad the contraction dim so weight rows line up with the
        # lane-aligned im2col stripes (padded rows are zero -> exact).
        w_full = jnp.pad(w_full, ((0, 0), (0, 0),
                                  (0, Cin_p - Cin), (0, Cout_p - Cout)))
        w_arg = w_full.reshape(kdim_p, Cout_p).astype(mxu_dtype)
        n_j = Cout_p // tn
        kernel = functools.partial(
            _conv_stats_kernel, tho=tho, wo=Wo, stride=stride,
            kh_sz=KH, kw_sz=KW, cin_p=Cin_p, ho_valid=Ho)
        y, stats = pl.pallas_call(
            kernel,
            grid=(N, n_t, n_j),
            in_specs=[
                pl.BlockSpec((1, Hpp, Wp, Cin_p), lambda n, t, j: (n, 0, 0, 0)),
                pl.BlockSpec((kdim_p, tn), lambda n, t, j: (0, j)),
            ],
            out_specs=[
                pl.BlockSpec((1, tho, Wo, tn), lambda n, t, j: (n, t, 0, j)),
                pl.BlockSpec((1, 1, 2, tn), lambda n, t, j: (n, t, 0, j)),
            ],
            out_shape=[
                jax.ShapeDtypeStruct((N, Ho_pad, Wo, Cout_p), y_dtype),
                jax.ShapeDtypeStruct((N, n_t, 2, Cout_p), jnp.float32),
            ],
            scratch_shapes=[pltpu.VMEM((tho * Wo, kdim_p), mxu_dtype)],
            compiler_params=pltpu.CompilerParams(
                dimension_semantics=("parallel", "parallel", "arbitrary"),
                vmem_limit_bytes=vmem_limit_bytes),
        )(x, w_arg)

    # ---- glue: Chan/Welford-style merge of per-tile partial stats, fold BN
    # (train mode, biased variance) into per-channel scale/shift --------------
    cnt = jnp.full((n_t,), float(tho * Wo), jnp.float32)
    cnt = cnt.at[n_t - 1].set(float((Ho - (n_t - 1) * tho) * Wo))
    cnt3 = cnt[None, :, None]
    s = stats[:, :, 0, :]                                  # (N, n_t, Cout_p)
    ss = stats[:, :, 1, :]
    total = float(N * Ho * Wo)
    mean = jnp.sum(s, axis=(0, 1)) / total                 # (Cout_p,)
    mean_t = s / cnt3
    m2_t = jnp.maximum(ss - s * mean_t, 0.0)               # per-tile centered
    m2 = jnp.sum(m2_t, axis=(0, 1)) + jnp.sum(cnt3 * (mean_t - mean) ** 2,
                                              axis=(0, 1))
    var = jnp.maximum(m2 / total, 0.0)
    gamma_p = jnp.pad(gamma.astype(jnp.float32), (0, Cout_p - Cout))
    beta_p = jnp.pad(beta.astype(jnp.float32), (0, Cout_p - Cout))
    scale_v = gamma_p * lax.rsqrt(var + eps)
    shift_v = beta_p - mean * scale_v
    scale = scale_v.reshape(1, Cout_p)
    shift = shift_v.reshape(1, Cout_p)

    # ---- pass 2: BN affine + SiLU over the flattened bf16 conv output -------
    rows = N * Ho_pad * Wo
    tr = (pass2_target_bytes // (Cout_p * 6)) // 8 * 8     # bf16 in + f32 out
    tr = min(rows, max(8, tr))
    out2d = pl.pallas_call(
        _bn_silu_kernel,
        grid=((rows + tr - 1) // tr,),                     # masked last tile ok
        in_specs=[
            pl.BlockSpec((tr, Cout_p), lambda r: (r, 0)),
            pl.BlockSpec((1, Cout_p), lambda r: (0, 0)),
            pl.BlockSpec((1, Cout_p), lambda r: (0, 0)),
        ],
        out_specs=pl.BlockSpec((tr, Cout_p), lambda r: (r, 0)),
        out_shape=jax.ShapeDtypeStruct((rows, Cout_p), out_dtype),
        compiler_params=pltpu.CompilerParams(
            dimension_semantics=("parallel",),
            vmem_limit_bytes=vmem_limit_bytes),
    )(y.reshape(rows, Cout_p), scale, shift)

    out = out2d.reshape(N, Ho_pad, Wo, Cout_p)[:, :Ho, :, :Cout]
    if channels_last_out:
        return out
    # TODO(synk): keep activations NHWC end-to-end in a full network; this
    # slice + transpose back to NCHW is an extra full-activation HBM round trip
    # that only exists to match the PyTorch NCHW interface.
    return jnp.transpose(out, (0, 3, 1, 2))


# ----------------------------------------------------------------------------
# Pure-JAX reference (same bf16 MXU input rounding; bias kept to show it
# cancels through train-mode BN)
# ----------------------------------------------------------------------------
def _reference(x_nchw, weight_oihw, conv_bias, gamma, beta, *,
               stride, padding, groups=1, eps=1e-5, mxu_dtype=jnp.bfloat16):
    x = jnp.transpose(x_nchw, (0, 2, 3, 1)).astype(mxu_dtype)
    w = jnp.transpose(weight_oihw, (2, 3, 1, 0)).astype(mxu_dtype)
    y = lax.conv_general_dilated(
        x, w, window_strides=(stride, stride),
        padding=[(padding, padding), (padding, padding)],
        dimension_numbers=("NHWC", "HWIO", "NHWC"),
        feature_group_count=groups,
        preferred_element_type=jnp.float32)
    y = y + conv_bias.reshape(1, 1, 1, -1).astype(jnp.float32)
    mean = jnp.mean(y, axis=(0, 1, 2), keepdims=True)
    var = jnp.mean((y - mean) ** 2, axis=(0, 1, 2), keepdims=True)
    y = (y - mean) * lax.rsqrt(var + eps) * gamma.reshape(1, 1, 1, -1) \
        + beta.reshape(1, 1, 1, -1)
    y = y * jax.nn.sigmoid(y)
    return jnp.transpose(y, (0, 3, 1, 2))


if __name__ == "__main__":
    key = jax.random.PRNGKey(0)

    def run_case(name, *, N, Cin, H, W, Cout, K, stride, padding, groups,
                 subkey, **kwargs):
        kx, kwt, kb, kg, kbe = jax.random.split(subkey, 5)
        x = jax.random.normal(kx, (N, Cin, H, W), dtype=jnp.float32)
        weight = 0.1 * jax.random.normal(
            kwt, (Cout, Cin // groups, K, K), dtype=jnp.float32)
        conv_bias = 0.1 * jax.random.normal(kb, (Cout,), dtype=jnp.float32)
        gamma = 1.0 + 0.1 * jax.random.normal(kg, (Cout,), dtype=jnp.float32)
        beta = 0.1 * jax.random.normal(kbe, (Cout,), dtype=jnp.float32)

        out = conv_block(x, weight, conv_bias, gamma, beta,
                         stride=stride, padding=padding, groups=groups,
                         **kwargs)
        out = jax.block_until_ready(out)
        ref = _reference(x, weight, conv_bias, gamma, beta,
                         stride=stride, padding=padding, groups=groups)
        Ho = (H + 2 * padding - K) // stride + 1
        Wo = (W + 2 * padding - K) // stride + 1
        assert out.shape == (N, Cout, Ho, Wo), (name, out.shape)
        # Tolerance sized for the bf16 conv intermediate (|err| <~ 2^-8 * |z|).
        assert bool(jnp.allclose(out, ref, rtol=2e-2, atol=1e-2)), name

    k1, k2, k3 = jax.random.split(key, 3)
    # Dense conv: 2 Ho tiles/image, lane-aligned im2col, and a multi-tile
    # pass 2 with an uneven (masked) final block.
    run_case("dense", N=2, Cin=4, H=16, W=16, Cout=8, K=3, stride=1, padding=1,
             groups=1, subkey=k1, target_block_rows=128,
             pass2_target_bytes=64 * 1024)
    # Depthwise conv: VPU FMA path with in-kernel row sub-chunking (2 chunks).
    run_case("depthwise", N=2, Cin=8, H=16, W=16, Cout=8, K=3, stride=1,
             padding=1, groups=8, subkey=k2, target_block_rows=256)
    # Awkward Ho (not divisible by the Ho tile): exercises the padded final Ho
    # tile, masked statistics and uneven per-tile counts in the Welford merge.
    run_case("odd_ho", N=2, Cin=5, H=15, W=16, Cout=6, K=3, stride=1,
             padding=1, groups=1, subkey=k3, target_block_rows=96)

    print("KERNEL_OK")
</pallas_src>

<mosaic_0001>
module attributes {stable_mosaic.version = 11 : i64} {
  func.func @_conv_stats_kernel(%arg0: i32, %arg1: i32, %arg2: i32, %arg3: memref<1x18x18x128xbf16, #tpu.memory_space<vmem>>, %arg4: memref<1152x128xbf16, #tpu.memory_space<vmem>>, %arg5: memref<1x8x16x128xbf16, #tpu.memory_space<vmem>>, %arg6: memref<1x1x2x128xf32, #tpu.memory_space<vmem>>, %arg7: memref<128x1152xbf16, #tpu.memory_space<vmem>>) attributes {dimension_semantics = [#tpu.dimension_semantics<parallel>, #tpu.dimension_semantics<parallel>, #tpu.dimension_semantics<arbitrary>], iteration_bounds = array<i64: 2, 2, 1>, scalar_prefetch = 0 : i64, scratch_operands = 1 : i64, tpu.core_type = #tpu.core_type<tc>, window_params = [{transform_indices = @transform_0, window_bounds = array<i64: 1, 18, 18, 128>}, {transform_indices = @transform_1, window_bounds = array<i64: 1152, 128>}, {transform_indices = @transform_2, window_bounds = array<i64: 1, 8, 16, 128>}, {transform_indices = @transform_3, window_bounds = array<i64: 1, 1, 2, 128>}]} {
    %c8_i32 = arith.constant 8 : i32
    %0 = arith.muli %arg1, %c8_i32 : i32
    %c0_i32 = arith.constant 0 : i32
    %1 = arith.cmpi eq, %arg2, %c0_i32 : i32
    %2 = arith.extui %1 : i1 to i32
    %c0_i32_0 = arith.constant 0 : i32
    %3 = arith.cmpi ne, %2, %c0_i32_0 : i32
    scf.if %3 {
      %c0_i32_17 = arith.constant 0 : i32
      %21 = arith.addi %0, %c0_i32_17 : i32
      %c0_18 = arith.constant 0 : index
      %22 = arith.index_cast %21 : i32 to index
      %c0_19 = arith.constant 0 : index
      %c0_20 = arith.constant 0 : index
      %23 = vector.load %arg3[%c0_18, %22, %c0_19, %c0_20] : memref<1x18x18x128xbf16, #tpu.memory_space<vmem>>, vector<1x8x16x128xbf16>
      %24 = vector.shape_cast %23 : vector<1x8x16x128xbf16> to vector<8x16x128xbf16>
      %25 = vector.shape_cast %24 : vector<8x16x128xbf16> to vector<128x128xbf16>
      %c0_21 = arith.constant 0 : index
      %c0_22 = arith.constant 0 : index
      %26 = vector.load %arg7[%c0_21, %c0_22] : memref<128x1152xbf16, #tpu.memory_space<vmem>>, vector<128x128xbf16>
      tpu.vector_store %arg7[%c0_21, %c0_22], %25 {strides = array<i32>} : memref<128x1152xbf16, #tpu.memory_space<vmem>>, vector<128x128xbf16>,
      %c0_i32_23 = arith.constant 0 : i32
      %27 = arith.addi %0, %c0_i32_23 : i32
      %c0_24 = arith.constant 0 : index
      %28 = arith.index_cast %27 : i32 to index
      %c1_25 = arith.constant 1 : index
      %c0_26 = arith.constant 0 : index
      %29 = vector.load %arg3[%c0_24, %28, %c1_25, %c0_26] : memref<1x18x18x128xbf16, #tpu.memory_space<vmem>>, vector<1x8x16x128xbf16>
      %30 = vector.shape_cast %29 : vector<1x8x16x128xbf16> to vector<8x16x128xbf16>
      %31 = vector.shape_cast %30 : vector<8x16x128xbf16> to vector<128x128xbf16>
      %c0_27 = arith.constant 0 : index
      %c128 = arith.constant 128 : index
      %32 = vector.load %arg7[%c0_27, %c128] : memref<128x1152xbf16, #tpu.memory_space<vmem>>, vector<128x128xbf16>
      tpu.vector_store %arg7[%c0_27, %c128], %31 {strides = array<i32>} : memref<128x1152xbf16, #tpu.memory_space<vmem>>, vector<128x128xbf16>,
      %c0_i32_28 = arith.constant 0 : i32
      %33 = arith.addi %0, %c0_i32_28 : i32
      %c0_29 = arith.constant 0 : index
      %34 = arith.index_cast %33 : i32 to index
      %c2 = arith.constant 2 : index
      %c0_30 = arith.constant 0 : index
      %35 = vector.load %arg3[%c0_29, %34, %c2, %c0_30] : memref<1x18x18x128xbf16, #tpu.memory_space<vmem>>, vector<1x8x16x128xbf16>
      %36 = vector.shape_cast %35 : vector<1x8x16x128xbf16> to vector<8x16x128xbf16>
      %37 = vector.shape_cast %36 : vector<8x16x128xbf16> to vector<128x128xbf16>
      %c0_31 = arith.constant 0 : index
      %c256 = arith.constant 256 : index
      %38 = vector.load %arg7[%c0_31, %c256] : memref<128x1152xbf16, #tpu.memory_space<vmem>>, vector<128x128xbf16>
      tpu.vector_store %arg7[%c0_31, %c256], %37 {strides = array<i32>} : memref<128x1152xbf16, #tpu.memory_space<vmem>>, vector<128x128xbf16>,
      %c1_i32 = arith.constant 1 : i32
      %39 = arith.addi %0, %c1_i32 : i32
      %c0_32 = arith.constant 0 : index
      %40 = arith.index_cast %39 : i32 to index
      %c0_33 = arith.constant 0 : index
      %c0_34 = arith.constant 0 : index
      %41 = vector.load %arg3[%c0_32, %40, %c0_33, %c0_34] : memref<1x18x18x128xbf16, #tpu.memory_space<vmem>>, vector<1x8x16x128xbf16>
      %42 = vector.shape_cast %41 : vector<1x8x16x128xbf16> to vector<8x16x128xbf16>
      %43 = vector.shape_cast %42 : vector<8x16x128xbf16> to vector<128x128xbf16>
      %c0_35 = arith.constant 0 : index
      %c384 = arith.constant 384 : index
      %44 = vector.load %arg7[%c0_35, %c384] : memref<128x1152xbf16, #tpu.memory_space<vmem>>, vector<128x128xbf16>
      tpu.vector_store %arg7[%c0_35, %c384], %43 {strides = array<i32>} : memref<128x1152xbf16, #tpu.memory_space<vmem>>, vector<128x128xbf16>,
      %c1_i32_36 = arith.constant 1 : i32
      %45 = arith.addi %0, %c1_i32_36 : i32
      %c0_37 = arith.constant 0 : index
      %46 = arith.index_cast %45 : i32 to index
      %c1_38 = arith.constant 1 : index
      %c0_39 = arith.constant 0 : index
      %47 = vector.load %arg3[%c0_37, %46, %c1_38, %c0_39] : memref<1x18x18x128xbf16, #tpu.memory_space<vmem>>, vector<1x8x16x128xbf16>
      %48 = vector.shape_cast %47 : vector<1x8x16x128xbf16> to vector<8x16x128xbf16>
      %49 = vector.shape_cast %48 : vector<8x16x128xbf16> to vector<128x128xbf16>
      %c0_40 = arith.constant 0 : index
      %c512 = arith.constant 512 : index
      %50 = vector.load %arg7[%c0_40, %c512] : memref<128x1152xbf16, #tpu.memory_space<vmem>>, vector<128x128xbf16>
      tpu.vector_store %arg7[%c0_40, %c512], %49 {strides = array<i32>} : memref<128x1152xbf16, #tpu.memory_space<vmem>>, vector<128x128xbf16>,
      %c1_i32_41 = arith.constant 1 : i32
      %51 = arith.addi %0, %c1_i32_41 : i32
      %c0_42 = arith.constant 0 : index
      %52 = arith.index_cast %51 : i32 to index
      %c2_43 = arith.constant 2 : index
      %c0_44 = arith.constant 0 : index
      %53 = vector.load %arg3[%c0_42, %52, %c2_43, %c0_44] : memref<1x18x18x128xbf16, #tpu.memory_space<vmem>>, vector<1x8x16x128xbf16>
      %54 = vector.shape_cast %53 : vector<1x8x16x128xbf16> to vector<8x16x128xbf16>
      %55 = vector.shape_cast %54 : vector<8x16x128xbf16> to vector<128x128xbf16>
      %c0_45 = arith.constant 0 : index
      %c640 = arith.constant 640 : index
      %56 = vector.load %arg7[%c0_45, %c640] : memref<128x1152xbf16, #tpu.memory_space<vmem>>, vector<128x128xbf16>
      tpu.vector_store %arg7[%c0_45, %c640], %55 {strides = array<i32>} : memref<128x1152xbf16, #tpu.memory_space<vmem>>, vector<128x128xbf16>,
      %c2_i32 = arith.constant 2 : i32
      %57 = arith.addi %0, %c2_i32 : i32
      %c0_46 = arith.constant 0 : index
      %58 = arith.index_cast %57 : i32 to index
      %c0_47 = arith.constant 0 : index
      %c0_48 = arith.constant 0 : index
      %59 = vector.load %arg3[%c0_46, %58, %c0_47, %c0_48] : memref<1x18x18x128xbf16, #tpu.memory_space<vmem>>, vector<1x8x16x128xbf16>
      %60 = vector.shape_cast %59 : vector<1x8x16x128xbf16> to vector<8x16x128xbf16>
      %61 = vector.shape_cast %60 : vector<8x16x128xbf16> to vector<128x128xbf16>
      %c0_49 = arith.constant 0 : index
      %c768 = arith.constant 768 : index
      %62 = vector.load %arg7[%c0_49, %c768] : memref<128x1152xbf16, #tpu.memory_space<vmem>>, vector<128x128xbf16>
      tpu.vector_store %arg7[%c0_49, %c768], %61 {strides = array<i32>} : memref<128x1152xbf16, #tpu.memory_space<vmem>>, vector<128x128xbf16>,
      %c2_i32_50 = arith.constant 2 : i32
      %63 = arith.addi %0, %c2_i32_50 : i32
      %c0_51 = arith.constant 0 : index
      %64 = arith.index_cast %63 : i32 to index
      %c1_52 = arith.constant 1 : index
      %c0_53 = arith.constant 0 : index
      %65 = vector.load %arg3[%c0_51, %64, %c1_52, %c0_53] : memref<1x18x18x128xbf16, #tpu.memory_space<vmem>>, vector<1x8x16x128xbf16>
      %66 = vector.shape_cast %65 : vector<1x8x16x128xbf16> to vector<8x16x128xbf16>
      %67 = vector.shape_cast %66 : vector<8x16x128xbf16> to vector<128x128xbf16>
      %c0_54 = arith.constant 0 : index
      %c896 = arith.constant 896 : index
      %68 = vector.load %arg7[%c0_54, %c896] : memref<128x1152xbf16, #tpu.memory_space<vmem>>, vector<128x128xbf16>
      tpu.vector_store %arg7[%c0_54, %c896], %67 {strides = array<i32>} : memref<128x1152xbf16, #tpu.memory_space<vmem>>, vector<128x128xbf16>,
      %c2_i32_55 = arith.constant 2 : i32
      %69 = arith.addi %0, %c2_i32_55 : i32
      %c0_56 = arith.constant 0 : index
      %70 = arith.index_cast %69 : i32 to index
      %c2_57 = arith.constant 2 : index
      %c0_58 = arith.constant 0 : index
      %71 = vector.load %arg3[%c0_56, %70, %c2_57, %c0_58] : memref<1x18x18x128xbf16, #tpu.memory_space<vmem>>, vector<1x8x16x128xbf16>
      %72 = vector.shape_cast %71 : vector<1x8x16x128xbf16> to vector<8x16x128xbf16>
      %73 = vector.shape_cast %72 : vector<8x16x128xbf16> to vector<128x128xbf16>
      %c0_59 = arith.constant 0 : index
      %c1024 = arith.constant 1024 : index
      %74 = vector.load %arg7[%c0_59, %c1024] : memref<128x1152xbf16, #tpu.memory_space<vmem>>, vector<128x128xbf16>
      tpu.vector_store %arg7[%c0_59, %c1024], %73 {strides = array<i32>} : memref<128x1152xbf16, #tpu.memory_space<vmem>>, vector<128x128xbf16>,
    } else {
    }
    %c0 = arith.constant 0 : index
    %c0_1 = arith.constant 0 : index
    %4 = vector.load %arg7[%c0, %c0_1] : memref<128x1152xbf16, #tpu.memory_space<vmem>>, vector<128x1152xbf16>
    %c0_2 = arith.constant 0 : index
    %c0_3 = arith.constant 0 : index
    %5 = vector.load %arg4[%c0_2, %c0_3] : memref<1152x128xbf16, #tpu.memory_space<vmem>>, vector<1152x128xbf16>
    %cst = arith.constant dense<0.000000e+00> : vector<128x128xf32>
    %6 = tpu.matmul %4, %5, %cst {dimension_numbers = #tpu.dot_dimension_numbers<[1], [0], [0], [1], [0, 0, 1, 1], [], []>} : vector<128x1152xbf16>, vector<1152x128xbf16>, vector<128x128xf32> -> vector<128x128xf32>
    %7 = vector.shape_cast %6 : vector<128x128xf32> to vector<1x8x16x128xf32>
    %8 = arith.truncf %7 : vector<1x8x16x128xf32> to vector<1x8x16x128xbf16>
    %c0_4 = arith.constant 0 : index
    %c0_5 = arith.constant 0 : index
    %c0_6 = arith.constant 0 : index
    %c0_7 = arith.constant 0 : index
    %9 = vector.load %arg5[%c0_4, %c0_5, %c0_6, %c0_7] : memref<1x8x16x128xbf16, #tpu.memory_space<vmem>>, vector<1x8x16x128xbf16>
    tpu.vector_store %arg5[%c0_4, %c0_5, %c0_6, %c0_7], %8 {strides = array<i32>} : memref<1x8x16x128xbf16, #tpu.memory_space<vmem>>, vector<1x8x16x128xbf16>,
    %cst_8 = arith.constant dense<0.000000e+00> : vector<128xf32>
    %10 = vector.multi_reduction <add>, %6, %cst_8 [0] : vector<128x128xf32> to vector<128xf32>
    %11 = vector.shape_cast %10 : vector<128xf32> to vector<1x128xf32>
    %c0_9 = arith.constant 0 : index
    %c0_10 = arith.constant 0 : index
    %c0_11 = arith.constant 0 : index
    %c0_12 = arith.constant 0 : index
    %12 = vector.load %arg6[%c0_9, %c0_10, %c0_11, %c0_12] : memref<1x1x2x128xf32, #tpu.memory_space<vmem>>, vector<1x1x1x128xf32>
    %13 = vector.shape_cast %12 : vector<1x1x1x128xf32> to vector<1x128xf32>
    %14 = vector.shape_cast %11 : vector<1x128xf32> to vector<1x1x1x128xf32>
    tpu.vector_store %arg6[%c0_9, %c0_10, %c0_11, %c0_12], %14 {strides = array<i32>} : memref<1x1x2x128xf32, #tpu.memory_space<vmem>>, vector<1x1x1x128xf32>,
    %15 = arith.mulf %6, %6 : vector<128x128xf32>
    %cst_13 = arith.constant dense<0.000000e+00> : vector<128xf32>
    %16 = vector.multi_reduction <add>, %15, %cst_13 [0] : vector<128x128xf32> to vector<128xf32>
    %17 = vector.shape_cast %16 : vector<128xf32> to vector<1x128xf32>
    %c0_14 = arith.constant 0 : index
    %c0_15 = arith.constant 0 : index
    %c1 = arith.constant 1 : index
    %c0_16 = arith.constant 0 : index
    %18 = vector.load %arg6[%c0_14, %c0_15, %c1, %c0_16] : memref<1x1x2x128xf32, #tpu.memory_space<vmem>>, vector<1x1x1x128xf32>
    %19 = vector.shape_cast %18 : vector<1x1x1x128xf32> to vector<1x128xf32>
    %20 = vector.shape_cast %17 : vector<1x128xf32> to vector<1x1x1x128xf32>
    tpu.vector_store %arg6[%c0_14, %c0_15, %c1, %c0_16], %20 {strides = array<i32>} : memref<1x1x2x128xf32, #tpu.memory_space<vmem>>, vector<1x1x1x128xf32>,
    return
  }
  func.func @transform_0(%arg0: i32, %arg1: i32, %arg2: i32) -> (i32, i32, i32, i32) {
    %c0_i32 = arith.constant 0 : i32
    %c0_i32_0 = arith.constant 0 : i32
    %c0_i32_1 = arith.constant 0 : i32
    %c0_i32_2 = arith.constant 0 : i32
    return %arg0, %c0_i32, %c0_i32_0, %c0_i32_1 : i32, i32, i32, i32
  }
  func.func @transform_1(%arg0: i32, %arg1: i32, %arg2: i32) -> (i32, i32) {
    %c0_i32 = arith.constant 0 : i32
    %c0_i32_0 = arith.constant 0 : i32
    return %c0_i32, %arg2 : i32, i32
  }
  func.func @transform_2(%arg0: i32, %arg1: i32, %arg2: i32) -> (i32, i32, i32, i32) {
    %c0_i32 = arith.constant 0 : i32
    %c0_i32_0 = arith.constant 0 : i32
    return %arg0, %arg1, %c0_i32, %arg2 : i32, i32, i32, i32
  }
  func.func @transform_3(%arg0: i32, %arg1: i32, %arg2: i32) -> (i32, i32, i32, i32) {
    %c0_i32 = arith.constant 0 : i32
    %c0_i32_0 = arith.constant 0 : i32
    return %arg0, %arg1, %c0_i32, %arg2 : i32, i32, i32, i32
  }
}

</mosaic_0001>

<bundles_post_ra>
// kernel: tpu_custom_call.1
= control target key start
LH: loop header
LB: loop body
LE: loop exit
PB: predicated region body
PF: predicated region fallthrough
CT: control target
= control target key end

     0   :  { %9 = vsyncpa [#allocation4], 0  ;;  %s5097_s0 = inlined_call_operand.vmem [shape: bf16[2,18,18,128], index: 0, kind: input, shape index: {}]   ;;  %s5098_s1 = inlined_call_operand.vmem [shape: bf16[1152,128], index: 1, kind: input, shape index: {}]   ;;  %s5099_s2 = inlined_call_operand.hbm [shape: bf16[2,16,16,128], index: 2, kind: output, shape index: {0}]   ;;  %s5100_s3 = inlined_call_operand.hbm [shape: f32[2,2,2,128], index: 3, kind: output, shape index: {1}]  }
   0x1   :  { %11 = vsyncpa [#allocation4 + $0x1], 0 }
   0x2   :  { %12 = vsyncpa [#allocation6], 0 }
   0x3   :  { %14 = vsyncpa [#allocation6 + $0x1], 0  ;;  %s4166_s12 = smov 0   ;;  %s4168_s13 = smov 0  }
   0x4   :  { %s4170_s14 = smov 0   ;;  %s4172_s15 = smov 0  }
   0x5   :  { %s4174_s16 = smov 0   ;;  %s4176_s17 = smov 0  }
   0x6   :  { %s4178_s18 = smov 0   ;;  %s4180_s19 = smov 0  }
   0x7 LB: > { %s3116_s20 = sadd.s32 4294967295, %s4140_s19   ;;  %s3117_s21 = sadd.s32 4294967294, %s4140_s19   ;;  %s4140_s19 = sphi %s4180_s19, %s20_s19   ;;  %s4136_s18 = sphi %s4178_s18, %s5113_s18   ;;  %s4132_s17 = sphi %s4176_s17, %s5112_s17   ;;  %s4128_s16 = sphi %s4174_s16, %s5111_s16   ;;  %s4124_s15 = sphi %s4172_s15, %s5110_s15   ;;  %s4120_s14 = sphi %s4170_s14, %s5109_s14   ;;  %s4116_s13 = sphi %s4168_s13, %s5108_s13   ;;  %s4112_s12 = sphi %s4166_s12, %s5107_s12  }
   0x8   : > { %s35_s22 = sadd.s32 1, %s4132_s17  ;;  %s39_s23 = sadd.s32 1, %s4136_s18 }
   0x9   : > { %p37_p0 = scmp.ge.s32.totalorder %s35_s22, 2  ;;  %p112_p1 = scmp.ne.s32.totalorder %s4120_s14, %s4116_s13 }
   0xa   : > { %p113_p2 = scmp.eq.s32.totalorder %s3116_s20, 3  ;;  %p118_p5 = scmp.ne.s32.totalorder %s4116_s13, %s4112_s12 }
   0xb   : > { %s5115_s22 = smov (%p37_p0, %s35_s22), 0  ;;  %s5117_s23 = smov (!%p37_p0, %s39_s23), %s4136_s18 }
   0xc   : > { %s96_s24 = ssub.s32 %s4132_s17, %s5115_s22  ;;  %p4217_p3 = por %p113_p2, %p112_p1 }
   0xd   : > { %p41_p4 = scmp.ge.s32.totalorder %s5117_s23, 2  ;;  %p119_p6 = scmp.eq.s32.totalorder %s3117_s21, 3 }
   0xe   : > { %p3121_p7 = scmp.ge.s32.totalorder %s4140_s19, 1  ;;  %p182_p9 = scmp.lt.s32.totalorder %s4140_s19, 5 }
   0xf   : > { %s5119_s23 = smov (%p41_p4, %s5117_s23), 0  ;;  %p4226_p8 = por %p119_p6, %p118_p5 }
  0x10   : > { %s95_s27 = ssub.s32 %s4136_s18, %s5119_s23  ;;  %s102_s28 = sadd.s32 1, %s4120_s14 }
  0x11   : > { %s97_s29 = sor.u32 %s96_s24, %s95_s27  ;;  %p183_p10 = pnand %p3121_p7, %p182_p9 }
  0x12   : > { %p100_p11 = scmp.eq.s32.totalorder %s97_s29, 0  ;;  %v3918_v0 = vld [vmem:[%s5098_s1 + $0x40] sm:$0xff] (!%p183_p10)   ;;  %v3922_v4 = vld [vmem:[%s5098_s1 + $0x48] sm:$0xff] (!%p183_p10)   ;;  %v3926_v8 = vld [vmem:[%s5098_s1 + $0x50] sm:$0xff] (!%p183_p10)   ;;  %p215_p12 = scmp.lt.s32.totalorder (!%p183_p10), %s4128_s16, 1  ;;  %vm613_vm0 = vcmask (!%p183_p10), 1042432  }
  0x13   : > { %186 = sbr.rel (%p183_p10) target bundleno = 476 (0x1dc), region = 28  ;;  %v3919_v1 = vld [vmem:[%s5098_s1 + $0xc0] sm:$0xff] (!%p183_p10)   ;;  %3519 = vmatprep.subr.bf16.mxu0 (!%p183_p10), %v3918_v0  ;;  %v3923_v5 = vld [vmem:[%s5098_s1 + $0xc8] sm:$0xff] (!%p183_p10)   ;;  %v3927_v9 = vld [vmem:[%s5098_s1 + $0xd0] sm:$0xff] (!%p183_p10)   ;;  %vm614_vm1 = vcmask (!%p183_p10), 1046532   ;;  %s3471_s10 = sshll.u32 (!%p183_p10), %s4124_s15, 4 }
  0x14   : > { %s4235_s30 = scalar_select %p100_p11, %s4120_s14, %s102_s28  }
  0x15   : > { %v3920_v2 = vld [vmem:[%s5098_s1] sm:$0xff] (!%p183_p10)   ;;  %3583 = vmatprep.subr.bf16.mxu1 (!%p183_p10), %v3919_v1  ;;  %v3924_v6 = vld [vmem:[%s5098_s1 + $0x8] sm:$0xff] (!%p183_p10)   ;;  %v3928_v10 = vld [vmem:[%s5098_s1 + $0x10] sm:$0xff] (!%p183_p10)   ;;  %s3454_s29 = smul.u32 (!%p183_p10), 96, %s4124_s15  ;;  %vm330_vm2 = vsmask.f32 (!%p183_p10), 3328 }
  0x16   : > { %v3921_v3 = vld [vmem:[%s5098_s1 + $0x80] sm:$0xff] (!%p183_p10)   ;;  %3520 = vmatpush3.bf16.msra.mxu0 (!%p183_p10), %v3920_v2  ;;  %v3925_v7 = vld [vmem:[%s5098_s1 + $0x88] sm:$0xff] (!%p183_p10)   ;;  %v3929_v11 = vld [vmem:[%s5098_s1 + $0x90] sm:$0xff] (!%p183_p10)   ;;  %vm331_vm3 = vsmask.f32 (!%p183_p10), 7440  ;;  %s3448_s11 = sshll.u32 (!%p183_p10), %s4128_s16, 5 }
  0x17   : > { %3584 = vmatpush3.bf16.msra.mxu1 (!%p183_p10), %v3921_v3  ;;  %3521 = vmatprep.subr.bf16.mxu0 (!%p183_p10), %v3922_v4  ;;  %v3930_v12 = vld [vmem:[%s5098_s1 + $0x58] sm:$0xff] (!%p183_p10)   ;;  %v3934_v16 = vld [vmem:[%s5098_s1 + $0x60] sm:$0xff] (!%p183_p10)   ;;  %v3938_v20 = vld [vmem:[%s5098_s1 + $0x68] sm:$0xff] (!%p183_p10)   ;;  %s4960_s20 = sadd.s32 (!%p183_p10), %s3471_s10, %s3448_s11  ;;  %s4142_s6 = smov (!%p183_p10), [#allocation3]  }
  0x18   : > { %3585 = vmatprep.subr.bf16.mxu1 (!%p183_p10), %v3923_v5  ;;  %v3931_v13 = vld [vmem:[%s5098_s1 + $0xd8] sm:$0xff] (!%p183_p10)   ;;  %v3935_v17 = vld [vmem:[%s5098_s1 + $0xe0] sm:$0xff] (!%p183_p10)   ;;  %v3939_v21 = vld [vmem:[%s5098_s1 + $0xe8] sm:$0xff] (!%p183_p10)   ;;  %s3449_s21 = sshll.u32 (!%p183_p10), %s4960_s20, 6 }
  0x19   : > { %v3932_v14 = vld [vmem:[%s5098_s1 + $0x18] sm:$0xff] (!%p183_p10)   ;;  %v3936_v18 = vld [vmem:[%s5098_s1 + $0x20] sm:$0xff] (!%p183_p10)   ;;  %v3940_v22 = vld [vmem:[%s5098_s1 + $0x28] sm:$0xff] (!%p183_p10)   ;;  %s4983_s5 = scalar_lea.hbm (!%p183_p10), %s5099_s2, %s3449_s21 }
  0x1a   : > { %3522 = vmatpush3.bf16.msra.mxu0 %v3924_v6  ;;  %v3933_v15 = vld [vmem:[%s5098_s1 + $0x98] sm:$0xff]   ;;  %s216_s24 = scalar_select %p215_p12, %s4128_s16, 1  ;;  %v3937_v19 = vld [vmem:[%s5098_s1 + $0xa0] sm:$0xff]   ;;  %v3941_v23 = vld [vmem:[%s5098_s1 + $0xa8] sm:$0xff]  }
  0x1b   : > { %3586 = vmatpush3.bf16.msra.mxu1 %v3925_v7  ;;  %3523 = vmatprep.subr.bf16.mxu0 %v3926_v8  ;;  %v3942_v24 = vld [vmem:[%s5098_s1 + $0x70] sm:$0xff]   ;;  %v3946_v28 = vld [vmem:[%s5098_s1 + $0x78] sm:$0xff]   ;;  %vm4347_vm4 = vmor %vm613_vm0, %vm614_vm1 }
  0x1c   : > { %3587 = vmatprep.subr.bf16.mxu1 %v3927_v9  ;;  %s3839_s9 = smul.u32 216, %s216_s24  ;;  %v3943_v25 = vld [vmem:[%s5098_s1 + $0xf0] sm:$0xff]   ;;  %v3947_v29 = vld [vmem:[%s5098_s1 + $0xf8] sm:$0xff]   ;;  %vm4356_vm5 = vmor %vm330_vm2, %vm331_vm3 }
  0x1d   : > { %v3944_v26 = vld [vmem:[%s5098_s1 + $0x30] sm:$0xff]   ;;  %v3948_v30 = vld [vmem:[%s5098_s1 + $0x38] sm:$0xff]   ;;  %v3952_v56 = vld [vmem:[%s5098_s1 + $0x140] sm:$0xff]  }
  0x1e   : > { %3524 = vmatpush3.bf16.msra.mxu0 %v3928_v10  ;;  %s219_s7 = scalar_lea.vmem %s5097_s0, %s3839_s9  ;;  %v3945_v27 = vld [vmem:[%s5098_s1 + $0xb0] sm:$0xff]   ;;  %v3949_v31 = vld [vmem:[%s5098_s1 + $0xb8] sm:$0xff]   ;;  %v3953_v10 = vld [vmem:[%s5098_s1 + $0x100] sm:$0xff]  }
  0x1f   : > { %3588 = vmatpush3.bf16.msra.mxu1 %v3929_v11  ;;  %3525 = vmatprep.subr.bf16.mxu0 %v3930_v12  ;;  %s4333_s28 = scalar_lea.vmem %s219_s7, %s3454_s29 }
  0x20   : > { %3589 = vmatprep.subr.bf16.mxu1 %v3931_v13  ;;  %v306_v32 = vld [vmem:[%s4333_s28] sm:$0xf]  ;;  %v307_v33 = vld [vmem:[%s4333_s28 + $0x4] sm:$0xf]  ;;  %v308_v34 = vld [vmem:[%s4333_s28 + $0x8] sm:$0x1] }
  0x21   : > { %v334_v35 = vshrl.u32 %v306_v32, 16  ;;  %v337_v36 = vshll.u32 %v306_v32, 16  ;;  %v343_v37 = vshll.u32 %v307_v33, 16  ;;  %v347_v38 = vshrl.u32 %v307_v33, 16  ;;  %v3950_v40 = vld [vmem:[%s4333_s28 + $0xc] sm:$0xff]   ;;  %v3951_v59 = vld [vmem:[%s4333_s28] sm:$0xff]  }
  0x22   : > { %3526 = vmatpush3.bf16.msra.mxu0 %v3932_v14  ;;  %v353_v39 = vshll.u32 %v308_v34, 16  ;;  %2441 = vmatprep.mubr.bf16.mxu1 %v3950_v40  ;;  %v565_v48 = vld [vmem:[%s4333_s28] sm:$0xe]  ;;  %v566_v49 = vld [vmem:[%s4333_s28 + $0x4] sm:$0xf]  ;;  %v3954_v13 = vld [vmem:[%s4333_s28 + $0x18] sm:$0xff]  }
  0x23   : > { %3590 = vmatpush3.bf16.msra.mxu1 %v3933_v15  ;;  %3527 = vmatprep.subr.bf16.mxu0 %v3934_v16  ;;  %v336_v41 = vrot.slane %v334_v35, 4  ;;  %v339_v42 = vrot.slane %v337_v36, 5  ;;  %v345_v43 = vrot.slane %v343_v37, 5  ;;  %v349_v44 = vrot.slane %v347_v38, 4  ;;  %v567_v50 = vld [vmem:[%s4333_s28 + $0x8] sm:$0x1] }
  0x24   : > { %3591 = vmatprep.subr.bf16.mxu1 %v3935_v17  ;;  %v355_v45 = vrot.slane %v353_v39, 5  ;;  %v3144_v53 = vrot.slane %v565_v48, 9  ;;  %v618_v54 = vrot.slane %v566_v49, 5  ;;  %v621_v55 = vrot.slane %v567_v50, 5  ;;  %v309_v62 = vld [vmem:[%s4333_s28 + $0xc] sm:$0xf] }
  0x25   : > { %v340_v47 = vor.u32 %v339_v42, %v336_v41  ;;  %v350_v52 = vor.u32 %v349_v44, %v345_v43  ;;  %v310_v0 = vld [vmem:[%s4333_s28 + $0x10] sm:$0xf]  ;;  %v311_v1 = vld [vmem:[%s4333_s28 + $0x14] sm:$0x1]  ;;  %v358_v2 = vshrl.u32 %v309_v62, 16  ;;  %v361_v3 = vshll.u32 %v309_v62, 16 }
  0x26   : > { %3528 = vmatpush3.bf16.msra.mxu0 %v3936_v18  ;;  %v619_v60 = vsel %vm4347_vm4, %v3144_v53, %v618_v54  ;;  %v620_v61 = vrot.slane %v618_v54, 4  ;;  %v367_v6 = vshll.u32 %v310_v0, 16  ;;  %v371_v7 = vshrl.u32 %v310_v0, 16  ;;  %v3956_v17 = vld [vmem:[%s5098_s1 + $0x148] sm:$0xff]   ;;  %v312_v33 = vld [vmem:[%s4333_s28 + $0x18] sm:$0xf] }
  0x27   : > { %3592 = vmatpush3.bf16.msra.mxu1 %v3937_v19  ;;  %3529 = vmatprep.subr.bf16.mxu0 %v3938_v20  ;;  %v341_v57 = vrot.slane %v340_v47, 4  ;;  %v351_v58 = vrot.slane %v350_v52, 4  ;;  %v360_v11 = vrot.slane %v358_v2, 4  ;;  %v363_v12 = vrot.slane %v361_v3, 5  ;;  %v568_v19 = vld [vmem:[%s4333_s28 + $0xc] sm:$0xe] }
  0x28   : > { %3593 = vmatprep.subr.bf16.mxu1 %v3939_v21  ;;  %v622_v5 = vsel %vm4347_vm4, %v620_v61, %v621_v55  ;;  %v369_v14 = vrot.slane %v367_v6, 5  ;;  %v373_v15 = vrot.slane %v371_v7, 4  ;;  %v377_v16 = vshll.u32 %v311_v1, 16  ;;  %v569_v20 = vld [vmem:[%s4333_s28 + $0x10] sm:$0xf]  ;;  %v3958_v48 = vld [vmem:[%s4333_s28 + $0x24] sm:$0xff]  }
  0x29   : > { %v346_v63 = vsel %vm4356_vm5, %v341_v57, %v345_v43  ;;  %v356_v4 = vsel %vm4356_vm5, %v351_v58, %v355_v45  ;;  %v3152_v9 = vcombine.low %v619_v60, %v622_v5  ;;  %v364_v18 = vor.u32 %v363_v12, %v360_v11  ;;  %v570_v21 = vld [vmem:[%s4333_s28 + $0x14] sm:$0x1]  ;;  %v313_v35 = vld [vmem:[%s4333_s28 + $0x1c] sm:$0xf]  ;;  %v314_v36 = vld [vmem:[%s4333_s28 + $0x20] sm:$0x1] }
  0x2a   : > { %3530 = vmatpush3.bf16.msra.mxu0 %v3940_v22  ;;  %v3136_v8 = vcombine.low %v346_v63, %v356_v4  ;;  %v374_v22 = vor.u32 %v373_v15, %v369_v14  ;;  %v382_v37 = vshrl.u32 %v312_v33, 16  ;;  %v385_v38 = vshll.u32 %v312_v33, 16  ;;  %v3960_v53 = vld [vmem:[%s5098_s1 + $0x150] sm:$0xff]   ;;  %v571_v55 = vld [vmem:[%s4333_s28 + $0x18] sm:$0xe]  ;;  %v3961_v62 = vld [vmem:[%s5098_s1 + $0x1c0] sm:$0xff]  }
  0x2b   : > { %3594 = vmatpush3.bf16.msra.mxu1 %v3941_v23  ;;  %3531 = vmatprep.subr.bf16.mxu0 %v3942_v24  ;;  %v379_v23 = vrot.slane %v377_v16, 5  ;;  %v3145_v24 = vrot.slane %v568_v19, 9  ;;  %v391_v41 = vshll.u32 %v313_v35, 16  ;;  %v395_v42 = vshrl.u32 %v313_v35, 16  ;;  %v573_v57 = vld [vmem:[%s4333_s28 + $0x20] sm:$0x1] }
  0x2c   : > { %3595 = vmatprep.subr.bf16.mxu1 %v3943_v25  ;;  %2344 = vmatprep.mubr.bf16.mxu0 %v3136_v8  ;;  %v625_v25 = vrot.slane %v569_v20, 5  ;;  %v384_v45 = vrot.slane %v382_v37, 4  ;;  %v387_v47 = vrot.slane %v385_v38, 5  ;;  %v401_v52 = vshll.u32 %v314_v36, 16  ;;  %v3959_v2 = vld [vmem:[%s4333_s28 + $0x18] sm:$0xff]   ;;  %v3962_v6 = vld [vmem:[%s5098_s1 + $0x110] sm:$0xff]  }
  0x2d   : > { %v393_v49 = vrot.slane %v391_v41, 5  ;;  %v397_v50 = vrot.slane %v395_v42, 4  ;;  %v3146_v60 = vrot.slane %v571_v55, 9  ;;  %v635_v0 = vrot.slane %v573_v57, 5  ;;  %v3964_v20 = vld [vmem:[%s4333_s28 + $0x30] sm:$0xff]   ;;  %v3967_v36 = vld [vmem:[%s5098_s1 + $0x1c8] sm:$0xff]  }
  0x2e   : > { %3532 = vmatpush3.bf16.msra.mxu0 %v3944_v26  ;;  %v3957_v26 = vld [vmem:[%s5098_s1 + $0x108] sm:$0xff]   ;;  %v627_v32 = vrot.slane %v625_v25, 4  ;;  %v388_v54 = vor.u32 %v387_v47, %v384_v45  ;;  %v3968_v42 = vld [vmem:[%s5098_s1 + $0x118] sm:$0xff]   ;;  %v318_v47 = vld [vmem:[%s4333_s28 + $0x30] sm:$0xf] }
  0x2f   : > { %3596 = vmatpush3.bf16.msra.mxu1 %v3945_v27  ;;  %3533 = vmatprep.subr.bf16.mxu0 %v3946_v28  ;;  %v365_v27 = vrot.slane %v364_v18, 4  ;;  %v628_v28 = vrot.slane %v570_v21, 5  ;;  %v398_v58 = vor.u32 %v397_v50, %v393_v49  ;;  %v3965_v38 = vld [vmem:[%s4333_s28 + $0x24] sm:$0xff]   ;;  %v319_v50 = vld [vmem:[%s4333_s28 + $0x34] sm:$0xf] }
  0x30   : > { %3597 = vmatprep.subr.bf16.mxu1 %v3947_v29  ;;  %v375_v29 = vrot.slane %v374_v22, 4  ;;  %v389_v63 = vrot.slane %v388_v54, 4  ;;  %v3969_v45 = vld [vmem:[%s5098_s1 + $0x188] sm:$0xff]   ;;  %v433_v54 = vshll.u32 %v318_v47, 16  ;;  %v439_v55 = vshll.u32 %v319_v50, 16 }
  0x31   : > { %v370_v34 = vsel %vm4356_vm5, %v365_v27, %v369_v14  ;;  %v629_v40 = vsel %vm4347_vm4, %v627_v32, %v628_v28  ;;  %v399_v1 = vrot.slane %v398_v58, 4  ;;  %v317_v14 = vld [vmem:[%s4333_s28 + $0x2c] sm:$0x1]  ;;  %v574_v27 = vld [vmem:[%s4333_s28 + $0x24] sm:$0xe]  ;;  %v3970_v58 = vld [vmem:[%s4333_s28 + $0x3c] sm:$0xff]  }
  0x32   : > { %3534 = vmatpush3.bf16.msra.mxu0 %v3948_v30  ;;  %v3955_v30 = vld [vmem:[%s4333_s28 + $0xc] sm:$0xff]   ;;  %v380_v39 = vsel %vm4356_vm5, %v375_v29, %v379_v23  ;;  %v394_v5 = vsel %vm4356_vm5, %v389_v63, %v393_v49  ;;  %v425_v19 = vshll.u32 %v317_v14, 16  ;;  %v575_v28 = vld [vmem:[%s4333_s28 + $0x28] sm:$0xf] }
  0x33   : > { %3598 = vmatpush3.bf16.msra.mxu1 %v3949_v31  ;;  %3647 = vmatprep.subr.bf16.mxu0 %v3952_v56  ;;  %v626_v31 = vsel %vm4347_vm4, %v3145_v24, %v625_v25  ;;  %v3137_v43 = vcombine.low %v370_v34, %v380_v39  ;;  %v572_v56 = vld [vmem:[%s4333_s28 + $0x1c] sm:$0xf]  ;;  %v576_v29 = vld [vmem:[%s4333_s28 + $0x2c] sm:$0x1]  ;;  %v639_v32 = vrot.slane %v575_v28, 5 }
  0x34   : > { %v3153_v44 = vcombine.low %v626_v31, %v629_v40  ;;  %v632_v61 = vrot.slane %v572_v56, 5  ;;  %3711 = vmatprep.subr.bf16.mxu1 %v3961_v62  ;;  %v427_v25 = vrot.slane %v425_v19, 5  ;;  %v3147_v31 = vrot.slane %v574_v27, 9  ;;  %v3966_v34 = vld [vmem:[%s5098_s1 + $0x158] sm:$0xff]   ;;  %v3975_v19 = vld [vmem:[%s5098_s1 + $0x190] sm:$0xff]  }
  0x35   : > { %2345 = vmatmul.mubr.bf16.vlgmr.msra.gmra.mrb[0].mxu0 %v3951_v59  ;;  %v403_v59 = vrot.slane %v401_v52, 5  ;;  %v642_v33 = vrot.slane %v576_v29, 5  ;;  %v641_v40 = vrot.slane %v639_v32, 4  ;;  %v320_v52 = vld [vmem:[%s4333_s28 + $0x38] sm:$0x1]  ;;  %v443_v56 = vshrl.u32 %v319_v50, 16 }
  0x36   : > { %2442 = vmatmul.mubr.bf16.vlgmr.msra.gmra.mrb[0].mxu1 %v3152_v9  ;;  %3648 = vmatpush3.bf16.msra.mxu0 %v3953_v10  ;;  %v633_v3 = vsel %vm4347_vm4, %v3146_v60, %v632_v61  ;;  %v634_v4 = vrot.slane %v632_v61, 4  ;;  %v3963_v9 = vld [vmem:[%s5098_s1 + $0x180] sm:$0xff]   ;;  %v640_v39 = vsel %vm4347_vm4, %v3147_v31, %v639_v32  ;;  %v449_v57 = vshll.u32 %v320_v52, 16  ;;  %v3336_v51 = vld [vmem:[%s4333_s28 + $0x68] sm:$0x1] }
  0x37   : > { %2449 = vmatprep.mubr.bf16.mxu1 %v3954_v13  ;;  %3649 = vmatprep.subr.bf16.mxu0 %v3956_v17  ;;  %v404_v7 = vsel %vm4356_vm5, %v399_v1, %v403_v59  ;;  %v315_v10 = vld [vmem:[%s4333_s28 + $0x24] sm:$0xf]  ;;  %v316_v13 = vld [vmem:[%s4333_s28 + $0x28] sm:$0xf]  ;;  %v435_v60 = vrot.slane %v433_v54, 5  ;;  %v441_v61 = vrot.slane %v439_v55, 5 }
  0x38   : > { %2352 = vmatprep.mubr.bf16.mxu0 %v3137_v43  ;;  %v636_v8 = vsel %vm4347_vm4, %v634_v4, %v635_v0  ;;  %v3138_v11 = vcombine.low %v394_v5, %v404_v7  ;;  %v406_v15 = vshrl.u32 %v315_v10, 16  ;;  %v409_v16 = vshll.u32 %v315_v10, 16  ;;  %3712 = vmatpush3.bf16.msra.mxu1 %v3963_v9  ;;  %v577_v1 = vld [vmem:[%s4333_s28 + $0x30] sm:$0xe]  ;;  %v3980_v54 = vld [vmem:[%s5098_s1 + $0x128] sm:$0xff]  }
  0x39   : > { %v3154_v12 = vcombine.low %v633_v3, %v636_v8  ;;  %v415_v17 = vshll.u32 %v316_v13, 16  ;;  %v419_v18 = vshrl.u32 %v316_v13, 16  ;;  %3713 = vmatprep.subr.bf16.mxu1 %v3967_v36  ;;  %v445_v62 = vrot.slane %v443_v56, 4  ;;  %v579_v3 = vld [vmem:[%s4333_s28 + $0x38] sm:$0x1]  ;;  %v3972_v8 = vld [vmem:[%s5098_s1 + $0x160] sm:$0xff]  }
  0x3a   : > { %3650 = vmatpush3.bf16.msra.mxu0 %v3957_v26  ;;  %v408_v21 = vrot.slane %v406_v15, 4  ;;  %v411_v22 = vrot.slane %v409_v16, 5  ;;  %v451_v63 = vrot.slane %v449_v57, 5  ;;  %v3148_v5 = vrot.slane %v577_v1, 9  ;;  %v3973_v10 = vld [vmem:[%s5098_s1 + $0x1d0] sm:$0xff]   ;;  %v3974_v16 = vld [vmem:[%s5098_s1 + $0x120] sm:$0xff]  }
  0x3b   : > { %3651 = vmatprep.subr.bf16.mxu0 %v3960_v53  ;;  %v417_v23 = vrot.slane %v415_v17, 5  ;;  %v421_v24 = vrot.slane %v419_v18, 4  ;;  %v430_v53 = vshrl.u32 %v318_v47, 16  ;;  %v446_v4 = vor.u32 %v445_v62, %v441_v61  ;;  %v3979_v47 = vld [vmem:[%s5098_s1 + $0x1d8] sm:$0xff]   ;;  %v326_v62 = vld [vmem:[%s4333_s28 + $0x50] sm:$0x1] }
  0x3c   : > { %v412_v26 = vor.u32 %v411_v22, %v408_v21  ;;  %3714 = vmatpush3.bf16.msra.mxu1 %v3969_v45  ;;  %v649_v7 = vrot.slane %v579_v3, 5  ;;  %v3981_v57 = vld [vmem:[%s5098_s1 + $0x198] sm:$0xff]   ;;  %v497_v3 = vshll.u32 %v326_v62, 16 }
  0x3d   : > { %2353 = vmatmul.mubr.bf16.gmra.mrb[4].mxu0 %v3955_v30  ;;  %v422_v30 = vor.u32 %v421_v24, %v417_v23  ;;  %v432_v59 = vrot.slane %v430_v53, 4  ;;  %3715 = vmatprep.subr.bf16.mxu1 %v3973_v10  ;;  %v323_v24 = vld [vmem:[%s4333_s28 + $0x44] sm:$0x1]  ;;  %v3991_v62 = vld [vmem:[%s4333_s28 + $0x54] sm:$0xff]  }
  0x3e   : > { %2450 = vmatmul.mubr.bf16.gmra.mrb[4].mxu1 %v3153_v44  ;;  %3652 = vmatpush3.bf16.msra.mxu0 %v3962_v6  ;;  %v413_v35 = vrot.slane %v412_v26, 4  ;;  %v643_v44 = vsel %vm4347_vm4, %v641_v40, %v642_v33  ;;  %v473_v29 = vshll.u32 %v323_v24, 16 }
  0x3f   : > { %2457 = vmatprep.mubr.bf16.mxu1 %v3958_v48  ;;  %2360 = vmatprep.mubr.bf16.mxu0 %v3138_v11  ;;  %v423_v37 = vrot.slane %v422_v30, 4  ;;  %v3155_v49 = vcombine.low %v640_v39, %v643_v44  ;;  %v436_v0 = vor.u32 %v435_v60, %v432_v59  ;;  %v447_v11 = vrot.slane %v446_v4, 4  ;;  %v3976_v30 = vld [vmem:[%s4333_s28 + $0x48] sm:$0xff]   ;;  %v582_v39 = vld [vmem:[%s4333_s28 + $0x44] sm:$0x1]  ;;  %v3982_v4 = vld [vmem:[%s4333_s28 + $0x54] sm:$0xff]  }
  0x40   : > { %3653 = vmatprep.subr.bf16.mxu0 %v3966_v34  ;;  %v418_v41 = vsel %vm4356_vm5, %v413_v35, %v417_v23  ;;  %v322_v23 = vld [vmem:[%s4333_s28 + $0x40] sm:$0xf]  ;;  %3716 = vmatpush3.bf16.msra.mxu1 %v3975_v19  ;;  %v475_v35 = vrot.slane %v473_v29, 5  ;;  %v3978_v44 = vld [vmem:[%s5098_s1 + $0x168] sm:$0xff]  }
  0x41   : > { %v428_v43 = vsel %vm4356_vm5, %v423_v37, %v427_v25  ;;  %v437_v9 = vrot.slane %v436_v0, 4  ;;  %v452_v17 = vsel %vm4356_vm5, %v447_v11, %v451_v63  ;;  %v463_v27 = vshll.u32 %v322_v23, 16  ;;  %v580_v37 = vld [vmem:[%s4333_s28 + $0x3c] sm:$0xe]  ;;  %3717 = vmatprep.subr.bf16.mxu1 %v3979_v47  ;;  %v583_v11 = vld [vmem:[%s4333_s28 + $0x48] sm:$0xe] }
  0x42   : > { %v3139_v48 = vcombine.low %v418_v41, %v428_v43  ;;  %3654 = vmatpush3.bf16.msra.mxu0 %v3968_v42  ;;  %v467_v28 = vshrl.u32 %v322_v23, 16  ;;  %v3149_v41 = vrot.slane %v580_v37, 9  ;;  %v656_v43 = vrot.slane %v582_v39, 5  ;;  %v3987_v29 = vld [vmem:[%s5098_s1 + $0x1a0] sm:$0xff]  }
  0x43   : > { %3655 = vmatprep.subr.bf16.mxu0 %v3972_v8  ;;  %v442_v15 = vsel %vm4356_vm5, %v437_v9, %v441_v61  ;;  %v465_v33 = vrot.slane %v463_v27, 5  ;;  %v325_v61 = vld [vmem:[%s4333_s28 + $0x4c] sm:$0xf]  ;;  %v499_v9 = vrot.slane %v497_v3, 5 }
  0x44   : > { %v3140_v21 = vcombine.low %v442_v15, %v452_v17  ;;  %v469_v34 = vrot.slane %v467_v28, 4  ;;  %3718 = vmatpush3.bf16.msra.mxu1 %v3981_v57  ;;  %v487_v1 = vshll.u32 %v325_v61, 16  ;;  %v3150_v15 = vrot.slane %v583_v11, 9  ;;  %v3219_v11 = vld [vmem:[%s4333_s28 + $0x10] sm:$0xf] }
  0x45   : > { %2361 = vmatmul.mubr.bf16.gmra.mrb[8].mxu0 %v3959_v2  ;;  %v578_v2 = vld [vmem:[%s4333_s28 + $0x34] sm:$0xf] }
  0x46   : > { %2458 = vmatmul.mubr.bf16.gmra.mrb[8].mxu1 %v3154_v12  ;;  %2368 = vmatprep.mubr.bf16.mxu0 %v3139_v48  ;;  %v646_v6 = vrot.slane %v578_v2, 5  ;;  %v3971_v12 = vld [vmem:[%s4333_s28 + $0x30] sm:$0xff]   ;;  %v470_v40 = vor.u32 %v469_v34, %v465_v33  ;;  %v491_v2 = vshrl.u32 %v325_v61, 16 }
  0x47   : > { %2465 = vmatprep.mubr.bf16.mxu1 %v3964_v20  ;;  %v321_v20 = vld [vmem:[%s4333_s28 + $0x3c] sm:$0xf]  ;;  %3656 = vmatpush3.bf16.msra.mxu0 %v3974_v16  ;;  %v327_v34 = vld [vmem:[%s4333_s28 + $0x54] sm:$0xf] }
  0x48   : > { %v647_v13 = vsel %vm4347_vm4, %v3148_v5, %v646_v6  ;;  %v648_v14 = vrot.slane %v646_v6, 4  ;;  %v454_v25 = vshrl.u32 %v321_v20, 16  ;;  %v457_v26 = vshll.u32 %v321_v20, 16  ;;  %3657 = vmatprep.subr.bf16.mxu0 %v3978_v44  ;;  %v3985_v20 = vld [vmem:[%s5098_s1 + $0x1e0] sm:$0xff]  }
  0x49   : > { %v471_v48 = vrot.slane %v470_v40, 4  ;;  %v493_v8 = vrot.slane %v491_v2, 4  ;;  %3719 = vmatprep.subr.bf16.mxu1 %v3985_v20  ;;  %v502_v37 = vshrl.u32 %v327_v34, 16  ;;  %v3994_v2 = vld [vmem:[%s5098_s1 + $0x138] sm:$0xff]  }
  0x4a   : > { %v650_v18 = vsel %vm4347_vm4, %v648_v14, %v649_v7  ;;  %v456_v31 = vrot.slane %v454_v25, 4  ;;  %v459_v32 = vrot.slane %v457_v26, 5  ;;  %v489_v7 = vrot.slane %v487_v1, 5  ;;  %v3986_v26 = vld [vmem:[%s5098_s1 + $0x130] sm:$0xff]   ;;  %3720 = vmatpush3.bf16.msra.mxu1 %v3987_v29 }
  0x4b   : > { %v3156_v22 = vcombine.low %v647_v13, %v650_v18  ;;  %v476_v55 = vsel %vm4356_vm5, %v471_v48, %v475_v35  ;;  %3658 = vmatpush3.bf16.msra.mxu0 %v3980_v54  ;;  %v585_v13 = vld [vmem:[%s4333_s28 + $0x50] sm:$0x1]  ;;  %v328_v35 = vld [vmem:[%s4333_s28 + $0x58] sm:$0xf] }
  0x4c   : > { %v460_v36 = vor.u32 %v459_v32, %v456_v31  ;;  %v494_v14 = vor.u32 %v493_v8, %v489_v7  ;;  %v663_v17 = vrot.slane %v585_v13, 5  ;;  %v3984_v18 = vld [vmem:[%s5098_s1 + $0x170] sm:$0xff]   ;;  %v3988_v32 = vld [vmem:[%s5098_s1 + $0x1e8] sm:$0xff]   ;;  %v511_v39 = vshll.u32 %v328_v35, 16  ;;  %v3996_v8 = vld [vmem:[%s5098_s1 + $0x1f8] sm:$0xff]  }
  0x4d   : > { %2369 = vmatmul.mubr.bf16.gmra.mrb[12].mxu0 %v3965_v38  ;;  %v581_v38 = vld [vmem:[%s4333_s28 + $0x40] sm:$0xf]  ;;  %3659 = vmatprep.subr.bf16.mxu0 %v3984_v18  ;;  %v515_v40 = vshrl.u32 %v328_v35, 16 }
  0x4e   : > { %2466 = vmatmul.mubr.bf16.gmra.mrb[12].mxu1 %v3155_v49  ;;  %2376 = vmatprep.mubr.bf16.mxu0 %v3140_v21  ;;  %v653_v42 = vrot.slane %v581_v38, 5  ;;  %v461_v45 = vrot.slane %v460_v36, 4  ;;  %v3977_v49 = vld [vmem:[%s4333_s28 + $0x3c] sm:$0xff]   ;;  %v495_v21 = vrot.slane %v494_v14, 4  ;;  %v505_v38 = vshll.u32 %v327_v34, 16 }
  0x4f   : > { %2473 = vmatprep.mubr.bf16.mxu1 %v3970_v58  ;;  %v324_v58 = vld [vmem:[%s4333_s28 + $0x48] sm:$0xf]  ;;  %3660 = vmatpush3.bf16.msra.mxu0 %v3986_v26  ;;  %v329_v36 = vld [vmem:[%s4333_s28 + $0x5c] sm:$0x1]  ;;  %v517_v47 = vrot.slane %v515_v40, 4  ;;  %v1094_v14 = vrot.slane %v3219_v11, 5 }
  0x50   : > { %v654_v50 = vsel %vm4347_vm4, %v3149_v41, %v653_v42  ;;  %v655_v52 = vrot.slane %v653_v42, 4  ;;  %v466_v53 = vsel %vm4356_vm5, %v461_v45, %v465_v33  ;;  %v478_v63 = vshrl.u32 %v324_v58, 16  ;;  %v3989_v33 = vld [vmem:[%s5098_s1 + $0x1a8] sm:$0xff]   ;;  %3721 = vmatprep.subr.bf16.mxu1 %v3988_v32  ;;  %v3990_v42 = vld [vmem:[%s4333_s28 + $0x60] sm:$0xff]   ;;  %v3188_v32 = vld [vmem:[%s4333_s28 + $0x14] sm:$0x1] }
  0x51   : > { %v3141_v59 = vcombine.low %v466_v53, %v476_v55  ;;  %v481_v0 = vshll.u32 %v324_v58, 16  ;;  %v500_v27 = vsel %vm4356_vm5, %v495_v21, %v499_v9  ;;  %v521_v41 = vshll.u32 %v329_v36, 16  ;;  %3722 = vmatpush3.bf16.msra.mxu1 %v3989_v33  ;;  %v588_v53 = vld [vmem:[%s4333_s28 + $0x5c] sm:$0x1]  ;;  %v3286_v18 = vld [vmem:[%s4333_s28 + $0x20] sm:$0x1] }
  0x52   : > { %v657_v56 = vsel %vm4347_vm4, %v655_v52, %v656_v43  ;;  %v480_v5 = vrot.slane %v478_v63, 4  ;;  %v504_v43 = vrot.slane %v502_v37, 4  ;;  %v507_v44 = vrot.slane %v505_v38, 5  ;;  %v587_v52 = vld [vmem:[%s4333_s28 + $0x58] sm:$0xf]  ;;  %v4593_v37 = vld [vmem:[%s5098_s1 + $0x200] sm:$0xff]  }
  0x53   : > { %v3157_v60 = vcombine.low %v654_v50, %v657_v56  ;;  %v483_v6 = vrot.slane %v481_v0, 5  ;;  %v513_v45 = vrot.slane %v511_v39, 5  ;;  %v523_v48 = vrot.slane %v521_v41, 5  ;;  %v586_v50 = vld [vmem:[%s4333_s28 + $0x54] sm:$0xe]  ;;  %v3992_v58 = vld [vmem:[%s5098_s1 + $0x178] sm:$0xff]  }
  0x54   : > { %v3151_v55 = vrot.slane %v586_v50, 9  ;;  %v667_v56 = vrot.slane %v587_v52, 5  ;;  %v670_v57 = vrot.slane %v588_v53, 5  ;;  %3661 = vmatprep.subr.bf16.mxu0 %v3992_v58  ;;  %v3997_v9 = vld [vmem:[%s5098_s1 + $0x1b8] sm:$0xff]   ;;  %v3186_v26 = vld [vmem:[%s4333_s28 + $0xc] sm:$0xf] }
  0x55   : > { %2377 = vmatmul.mubr.bf16.gmra.mrb[16].mxu0 %v3971_v12  ;;  %v484_v10 = vor.u32 %v483_v6, %v480_v5  ;;  %v584_v12 = vld [vmem:[%s4333_s28 + $0x4c] sm:$0xf]  ;;  %v518_v54 = vor.u32 %v517_v47, %v513_v45  ;;  %v3995_v5 = vld [vmem:[%s5098_s1 + $0x1b0] sm:$0xff]   ;;  %v813_v35 = vshrl.u32 %v3186_v26, 16  ;;  %v816_v36 = vshll.u32 %v3186_v26, 16  ;;  %v3998_v50 = vld [vmem:[%s4333_s28 + $0x18] sm:$0xff]  }
  0x56   : > { %2474 = vmatmul.mubr.bf16.gmra.mrb[16].mxu1 %v3156_v22  ;;  %2384 = vmatprep.mubr.bf16.mxu0 %v3141_v59  ;;  %v660_v16 = vrot.slane %v584_v12, 5  ;;  %v3983_v22 = vld [vmem:[%s4333_s28 + $0x48] sm:$0xff]   ;;  %v668_v63 = vsel %vm4347_vm4, %v3151_v55, %v667_v56  ;;  %v669_v0 = vrot.slane %v667_v56, 4  ;;  %v3220_v12 = vld [vmem:[%s4333_s28 + $0x14] sm:$0x1] }
  0x57   : > { %2481 = vmatprep.mubr.bf16.mxu1 %v3976_v30  ;;  %v485_v19 = vrot.slane %v484_v10, 4  ;;  %v519_v61 = vrot.slane %v518_v54, 4  ;;  %3662 = vmatpush3.bf16.msra.mxu0 %v3994_v2  ;;  %v3218_v10 = vld [vmem:[%s4333_s28 + $0xc] sm:$0xe]  ;;  %v3221_v52 = vld [vmem:[%s4333_s28 + $0x18] sm:$0xe] }
  0x58   : > { %v661_v23 = vsel %vm4347_vm4, %v3150_v15, %v660_v16  ;;  %v662_v24 = vrot.slane %v660_v16, 4  ;;  %v3242_v13 = vrot.slane %v3218_v10, 9  ;;  %v1097_v15 = vrot.slane %v3220_v12, 5  ;;  %v3284_v16 = vld [vmem:[%s4333_s28 + $0x18] sm:$0xf]  ;;  %3791 = vmatprep.subr.bf16.mxu0 %v4593_v37  ;;  %v4615_v11 = vld [vmem:[%s5098_s1 + $0x208] sm:$0xff]  }
  0x59   : > { %v490_v25 = vsel %vm4356_vm5, %v485_v19, %v489_v7  ;;  %v524_v3 = vsel %vm4356_vm5, %v519_v61, %v523_v48  ;;  %v1289_v19 = vshrl.u32 %v3284_v16, 16  ;;  %v1292_v20 = vshll.u32 %v3284_v16, 16  ;;  %v3222_v56 = vld [vmem:[%s4333_s28 + $0x1c] sm:$0xf]  ;;  %v3191_v16 = vld [vmem:[%s4333_s28 + $0x20] sm:$0x1] }
  0x5a   : > { %v664_v28 = vsel %vm4347_vm4, %v662_v24, %v663_v17  ;;  %v3142_v30 = vcombine.low %v490_v25, %v500_v27  ;;  %v3285_v17 = vld [vmem:[%s4333_s28 + $0x1c] sm:$0xf]  ;;  %v1096_v24 = vrot.slane %v1094_v14, 4  ;;  %v1308_v25 = vshll.u32 %v3286_v18, 16  ;;  %v3187_v27 = vld [vmem:[%s4333_s28 + $0x10] sm:$0xf] }
  0x5b   : > { %v3158_v31 = vcombine.low %v661_v23, %v664_v28  ;;  %v1298_v21 = vshll.u32 %v3285_v17, 16  ;;  %v1095_v23 = vsel %vm4347_vm4, %v3242_v13, %v1094_v14  ;;  %v1291_v28 = vrot.slane %v1289_v19, 4  ;;  %v3190_v10 = vld [vmem:[%s4333_s28 + $0x1c] sm:$0xf] }
  0x5c   : > { %v1294_v29 = vrot.slane %v1292_v20, 5  ;;  %v1098_v33 = vsel %vm4347_vm4, %v1096_v24, %v1097_v15  ;;  %v1310_v34 = vrot.slane %v1308_v25, 5  ;;  %v822_v41 = vshll.u32 %v3187_v27, 16 }
  0x5d   : > { %2385 = vmatmul.mubr.bf16.gmra.mrb[20].mxu0 %v3977_v49  ;;  %v508_v49 = vor.u32 %v507_v44, %v504_v43  ;;  %v3250_v38 = vcombine.low %v1095_v23, %v1098_v33  ;;  %v818_v43 = vrot.slane %v816_v36, 5  ;;  %v826_v44 = vshrl.u32 %v3187_v27, 16 }
  0x5e   : > { %2482 = vmatmul.mubr.bf16.gmra.mrb[20].mxu1 %v3157_v60  ;;  %2392 = vmatprep.mubr.bf16.mxu0 %v3142_v30  ;;  %v3993_v60 = vld [vmem:[%s5098_s1 + $0x1f0] sm:$0xff]   ;;  %v1300_v30 = vrot.slane %v1298_v21, 5  ;;  %v1295_v39 = vor.u32 %v1294_v29, %v1291_v28  ;;  %v1101_v61 = vrot.slane %v3222_v56, 5  ;;  %v3224_v29 = vld [vmem:[%s4333_s28 + $0x24] sm:$0xe]  ;;  %v850_v33 = vshrl.u32 %v3190_v10, 16 }
  0x5f   : > { %2489 = vmatprep.mubr.bf16.mxu1 %v3982_v4  ;;  %v509_v59 = vrot.slane %v508_v49, 4  ;;  %3723 = vmatprep.subr.bf16.mxu1 %v3993_v60  ;;  %v671_v4 = vsel %vm4347_vm4, %v669_v0, %v670_v57  ;;  %v824_v49 = vrot.slane %v822_v41, 5  ;;  %v828_v54 = vrot.slane %v826_v44, 4  ;;  %v3223_v57 = vld [vmem:[%s4333_s28 + $0x20] sm:$0x1]  ;;  %v4000_v56 = vld [vmem:[%s4333_s28 + $0x24] sm:$0xff]  }
  0x60   : > { %v3159_v7 = vcombine.low %v668_v63, %v671_v4  ;;  %3724 = vmatpush3.bf16.msra.mxu1 %v3995_v5  ;;  %v1296_v47 = vrot.slane %v1295_v39, 4  ;;  %v3243_v60 = vrot.slane %v3221_v52, 9  ;;  %v3288_v63 = vld [vmem:[%s4333_s28 + $0x28] sm:$0xf]  ;;  %v3289_v4 = vld [vmem:[%s4333_s28 + $0x2c] sm:$0x1] }
  0x61   : > { %v514_v1 = vsel %vm4356_vm5, %v509_v59, %v513_v45  ;;  %3725 = vmatprep.subr.bf16.mxu1 %v3996_v8  ;;  %v832_v45 = vshll.u32 %v3188_v32, 16  ;;  %v829_v2 = vor.u32 %v828_v54, %v824_v49  ;;  %v3189_v5 = vld [vmem:[%s4333_s28 + $0x18] sm:$0xf]  ;;  %v1322_v14 = vshll.u32 %v3288_v63, 16 }
  0x62   : > { %v3143_v6 = vcombine.low %v514_v1, %v524_v3  ;;  %v1301_v58 = vsel %vm4356_vm5, %v1296_v47, %v1300_v30  ;;  %v1104_v3 = vrot.slane %v3223_v57, 5  ;;  %v1326_v15 = vshrl.u32 %v3288_v63, 16  ;;  %v3290_v47 = vld [vmem:[%s4333_s28 + $0x30] sm:$0xf]  ;;  %v3292_v57 = vld [vmem:[%s4333_s28 + $0x38] sm:$0x1] }
  0x63   : > { %v834_v55 = vrot.slane %v832_v45, 5  ;;  %v830_v13 = vrot.slane %v829_v2, 4  ;;  %v1332_v20 = vshll.u32 %v3289_v4, 16  ;;  %v1324_v23 = vrot.slane %v1322_v14, 5 }
  0x64   : > { %3726 = vmatpush3.bf16.msra.mxu1 %v3997_v9  ;;  %v1328_v24 = vrot.slane %v1326_v15, 4  ;;  %v837_v28 = vshrl.u32 %v3189_v5, 16  ;;  %v846_v32 = vshll.u32 %v3190_v10, 16  ;;  %v856_v39 = vshll.u32 %v3191_v16, 16  ;;  %v4667_v15 = vld [vmem:[%s5098_s1 + $0x220] sm:$0xff]  }
  0x65   : > { %2393 = vmatmul.mubr.bf16.gmra.mrb[24].mxu0 %v3983_v22  ;;  %v1302_v22 = vshrl.u32 %v3285_v17, 16  ;;  %3823 = vmatprep.subr.bf16.mxu1 %v4593_v37  ;;  %v835_v21 = vsel %vm4356_vm5, %v830_v13, %v834_v55  ;;  %v1334_v27 = vrot.slane %v1332_v20, 5  ;;  %v3244_v41 = vrot.slane %v3224_v29, 9  ;;  %v3227_v20 = vld [vmem:[%s4333_s28 + $0x30] sm:$0xe] }
  0x66   : > { %2490 = vmatmul.mubr.bf16.gmra.mrb[24].mxu1 %v3158_v31  ;;  %2400 = vmatprep.mubr.bf16.mxu0 %v3143_v6  ;;  %v1102_v6 = vsel %vm4347_vm4, %v3243_v60, %v1101_v61  ;;  %v848_v44 = vrot.slane %v846_v32, 5  ;;  %v852_v45 = vrot.slane %v850_v33, 4  ;;  %v1340_v63 = vshll.u32 %v3290_v47, 16 }
  0x67   : > { %2497 = vmatprep.mubr.bf16.mxu1 %v3990_v42  ;;  %v1304_v31 = vrot.slane %v1302_v22, 4  ;;  %v815_v42 = vrot.slane %v813_v35, 4  ;;  %v4631_v35 = vld [vmem:[%s5098_s1 + $0x210] sm:$0xff]   ;;  %v1356_v10 = vshll.u32 %v3292_v57, 16 }
  0x68   : > { %v853_v55 = vor.u32 %v852_v45, %v848_v44 }
  0x69   : > { %v1305_v40 = vor.u32 %v1304_v31, %v1300_v30  ;;  %v819_v53 = vor.u32 %v818_v43, %v815_v42  ;;  %v1329_v30 = vor.u32 %v1328_v24, %v1324_v23  ;;  %v840_v31 = vshll.u32 %v3189_v5, 16 }
  0x6b   : > { %v1306_v48 = vrot.slane %v1305_v40, 4  ;;  %v820_v1 = vrot.slane %v819_v53, 4  ;;  %v3226_v40 = vld [vmem:[%s4333_s28 + $0x2c] sm:$0x1]  ;;  %v1330_v42 = vrot.slane %v1329_v30, 4  ;;  %v842_v43 = vrot.slane %v840_v31, 5 }
  0x6c   : > { %v1111_v52 = vrot.slane %v3226_v40, 5  ;;  %v3291_v53 = vld [vmem:[%s4333_s28 + $0x34] sm:$0xf]  ;;  %v3245_v30 = vrot.slane %v3227_v20, 9  ;;  %v3293_v31 = vld [vmem:[%s4333_s28 + $0x3c] sm:$0xf] }
  0x6d   : > { %2401 = vmatmul.mubr.bf16.gmra.mrb[28].mxu0 %v3991_v62  ;;  %v1311_v59 = vsel %vm4356_vm5, %v1306_v48, %v1310_v34  ;;  %v3287_v62 = vld [vmem:[%s4333_s28 + $0x24] sm:$0xf]  ;;  %v825_v12 = vsel %vm4356_vm5, %v820_v1, %v824_v49  ;;  %v3225_v34 = vld [vmem:[%s4333_s28 + $0x28] sm:$0xf]  ;;  %v858_v49 = vrot.slane %v856_v39, 5  ;;  %v1346_v5 = vshll.u32 %v3291_v53, 16 }
  0x6e   : > { %2498 = vmatmul.mubr.bf16.gmra.mrb[28].mxu1 %v3159_v7  ;;  %2538 = vmatprep.mubr.bf16.mxu0 %v3250_v38  ;;  %v3308_v0 = vcombine.low %v1301_v58, %v1311_v59  ;;  %v1103_v7 = vrot.slane %v1101_v61, 4  ;;  %v1313_v8 = vshrl.u32 %v3287_v62, 16  ;;  %v1316_v9 = vshll.u32 %v3287_v62, 16  ;;  %v4648_v59 = vld [vmem:[%s5098_s1 + $0x218] sm:$0xff]   ;;  %v3193_v1 = vld [vmem:[%s4333_s28 + $0x28] sm:$0xf] }
  0x6f   : > { %v3210_v25 = vcombine.low %v825_v12, %v835_v21  ;;  %v839_v38 = vrot.slane %v837_v28, 4  ;;  %v1337_v58 = vshrl.u32 %v3290_v47, 16  ;;  %v1348_v14 = vrot.slane %v1346_v5, 5  ;;  %v3228_v21 = vld [vmem:[%s4333_s28 + $0x34] sm:$0xf] }
  0x70   : > { %2635 = vmatprep.mubr.bf16.mxu1 %v3308_v0  ;;  %v1105_v17 = vsel %vm4347_vm4, %v1103_v7, %v1104_v3  ;;  %v1315_v18 = vrot.slane %v1313_v8, 4  ;;  %v1318_v19 = vrot.slane %v1316_v9, 5  ;;  %v3192_v0 = vld [vmem:[%s4333_s28 + $0x24] sm:$0xf]  ;;  %v854_v3 = vrot.slane %v853_v55, 4  ;;  %v4002_v40 = vld [vmem:[%s4333_s28 + $0x30] sm:$0xff]  }
  0x71   : > { %v3251_v22 = vcombine.low %v1102_v6, %v1105_v17  ;;  %v843_v54 = vor.u32 %v842_v43, %v839_v38  ;;  %v1339_v4 = vrot.slane %v1337_v58, 4  ;;  %v3194_v6 = vld [vmem:[%s4333_s28 + $0x2c] sm:$0x1]  ;;  %v1342_v8 = vrot.slane %v1340_v63, 5  ;;  %v3294_v47 = vld [vmem:[%s4333_s28 + $0x40] sm:$0xf] }
  0x72   : > { %v1319_v26 = vor.u32 %v1318_v19, %v1315_v18  ;;  %v1350_v9 = vshrl.u32 %v3291_v53, 16  ;;  %v1358_v19 = vrot.slane %v1356_v10, 5  ;;  %v870_v24 = vshll.u32 %v3193_v1, 16  ;;  %v3196_v55 = vld [vmem:[%s4333_s28 + $0x34] sm:$0xf] }
  0x73   : > { %v844_v2 = vrot.slane %v843_v54, 4  ;;  %v1343_v17 = vor.u32 %v1342_v8, %v1339_v4  ;;  %v880_v29 = vshll.u32 %v3194_v6, 16  ;;  %v3195_v54 = vld [vmem:[%s4333_s28 + $0x30] sm:$0xf]  ;;  %v1374_v63 = vshrl.u32 %v3294_v47, 16 }
  0x74   : > { %v1320_v36 = vrot.slane %v1319_v26, 4  ;;  %v1352_v18 = vrot.slane %v1350_v9, 4  ;;  %v3229_v26 = vld [vmem:[%s4333_s28 + $0x38] sm:$0x1]  ;;  %v4011_v5 = vld [vmem:[%s5098_s1 + $0x230] sm:$0xff]  }
  0x75   : > { %2539 = vmatmul.mubr.bf16.vlgmr.msra.gmra.mrb[32].mxu0 %v3210_v25  ;;  %v849_v12 = vsel %vm4356_vm5, %v844_v2, %v848_v44  ;;  %v874_v25 = vshrl.u32 %v3193_v1, 16  ;;  %v882_v39 = vrot.slane %v880_v29, 5  ;;  %v1118_v45 = vrot.slane %v3229_v26, 5  ;;  %v3197_v4 = vld [vmem:[%s4333_s28 + $0x38] sm:$0x1] }
  0x76   : > { %2636 = vmatmul.mubr.bf16.vlgmr.msra.gmra.mrb[32].mxu1 %v3998_v50  ;;  %3792 = vmatpush3.bf16.msra.mxu0 %v4593_v37  ;;  %v1325_v48 = vsel %vm4356_vm5, %v1320_v36, %v1324_v23  ;;  %v1108_v50 = vrot.slane %v3225_v34, 5  ;;  %v864_v23 = vshll.u32 %v3192_v0, 16  ;;  %v1353_v28 = vor.u32 %v1352_v18, %v1348_v14  ;;  %v3230_v10 = vld [vmem:[%s4333_s28 + $0x3c] sm:$0xe] }
  0x77   : > { %3831 = vmatpush3.bf16.msra.mxu1 %v4593_v37  ;;  %2546 = vmatprep.mubr.bf16.mxu0 %v3251_v22  ;;  %v1335_v37 = vsel %vm4356_vm5, %v1330_v42, %v1334_v27  ;;  %v861_v22 = vshrl.u32 %v3192_v0, 16  ;;  %v1344_v27 = vrot.slane %v1343_v17, 4  ;;  %v872_v34 = vrot.slane %v870_v24, 5  ;;  %v4009_v42 = vld [vmem:[%s5098_s1 + $0x228] sm:$0xff]   ;;  %v3232_v17 = vld [vmem:[%s4333_s28 + $0x44] sm:$0x1] }
  0x78   : > { %3824 = vmatprep.subr.bf16.mxu1 %v4615_v11  ;;  %3793 = vmatprep.subr.bf16.mxu0 %v4615_v11  ;;  %v3309_v60 = vcombine.low %v1325_v48, %v1335_v37  ;;  %v1109_v61 = vsel %vm4347_vm4, %v3244_v41, %v1108_v50  ;;  %v1110_v62 = vrot.slane %v1108_v50, 4  ;;  %v866_v33 = vrot.slane %v864_v23, 5  ;;  %v3295_v48 = vld [vmem:[%s4333_s28 + $0x44] sm:$0x1] }
  0x79   : > { %v863_v32 = vrot.slane %v861_v22, 4  ;;  %v876_v36 = vrot.slane %v874_v25, 4  ;;  %v1354_v38 = vrot.slane %v1353_v28, 4  ;;  %v1115_v41 = vrot.slane %v3228_v21, 5  ;;  %v3296_v21 = vld [vmem:[%s4333_s28 + $0x48] sm:$0xf] }
  0x7a   : > { %3794 = vmatpush3.bf16.msra.mxu0 %v4615_v11  ;;  %2643 = vmatprep.mubr.bf16.mxu1 %v3309_v60  ;;  %v1112_v7 = vsel %vm4347_vm4, %v1110_v62, %v1111_v52  ;;  %v1364_v37 = vshll.u32 %v3293_v31, 16  ;;  %v1370_v62 = vshll.u32 %v3294_v47, 16  ;;  %v1376_v9 = vrot.slane %v1374_v63, 4  ;;  %v4013_v22 = vld [vmem:[%s5098_s1 + $0x238] sm:$0xff]   ;;  %v3233_v63 = vld [vmem:[%s4333_s28 + $0x48] sm:$0xe] }
  0x7b   : > { %3832 = vmatpush3.bf16.msra.mxu1 %v4615_v11  ;;  %3795 = vmatprep.subr.bf16.mxu0 %v4631_v35  ;;  %v859_v11 = vsel %vm4356_vm5, %v854_v3, %v858_v49  ;;  %v3252_v13 = vcombine.low %v1109_v61, %v1112_v7  ;;  %v867_v43 = vor.u32 %v866_v33, %v863_v32  ;;  %v1361_v49 = vshrl.u32 %v3293_v31, 16  ;;  %v4004_v33 = vld [vmem:[%s4333_s28 + $0x3c] sm:$0xff]  }
  0x7c   : > { %3825 = vmatprep.subr.bf16.mxu1 %v4631_v35  ;;  %v3211_v16 = vcombine.low %v849_v12, %v859_v11  ;;  %v877_v44 = vor.u32 %v876_v36, %v872_v34  ;;  %v1359_v50 = vsel %vm4356_vm5, %v1354_v38, %v1358_v19  ;;  %v1116_v52 = vsel %vm4347_vm4, %v3245_v30, %v1115_v41  ;;  %v3231_v12 = vld [vmem:[%s4333_s28 + $0x40] sm:$0xf] }
  0x7d   : > { %v1117_v53 = vrot.slane %v1115_v41, 4  ;;  %v868_v57 = vrot.slane %v867_v43, 4  ;;  %v1363_v60 = vrot.slane %v1361_v49, 4  ;;  %v1366_v61 = vrot.slane %v1364_v37, 5  ;;  %v3198_v43 = vld [vmem:[%s4333_s28 + $0x3c] sm:$0xf] }
  0x7e   : > { %2644 = vmatmul.mubr.bf16.gmra.mrb[36].mxu1 %v4000_v56  ;;  %3796 = vmatpush3.bf16.msra.mxu0 %v4631_v35  ;;  %v878_v58 = vrot.slane %v877_v44, 4  ;;  %v1380_v3 = vshll.u32 %v3295_v48, 16  ;;  %v1372_v8 = vrot.slane %v1370_v62, 5  ;;  %v898_v19 = vshrl.u32 %v3196_v55, 16 }
  0x7f   : > { %3833 = vmatpush3.bf16.msra.mxu1 %v4631_v35  ;;  %2547 = vmatmul.mubr.bf16.gmra.mrb[36].mxu0 %v3211_v16  ;;  %v1349_v35 = vsel %vm4356_vm5, %v1344_v27, %v1348_v14  ;;  %v873_v0 = vsel %vm4356_vm5, %v868_v57, %v872_v34  ;;  %v1367_v7 = vor.u32 %v1366_v61, %v1363_v60  ;;  %v888_v14 = vshll.u32 %v3195_v54, 16  ;;  %v3297_v27 = vld [vmem:[%s4333_s28 + $0x4c] sm:$0xf]  ;;  %v3199_v57 = vld [vmem:[%s4333_s28 + $0x40] sm:$0xf] }
  0x80   : > { %3826 = vmatprep.subr.bf16.mxu1 %v4648_v59  ;;  %3797 = vmatprep.subr.bf16.mxu0 %v4648_v59  ;;  %v3310_v56 = vcombine.low %v1349_v35, %v1359_v50  ;;  %v883_v1 = vsel %vm4356_vm5, %v878_v58, %v882_v39  ;;  %v1382_v11 = vrot.slane %v1380_v3, 5  ;;  %v894_v16 = vshll.u32 %v3196_v55, 16  ;;  %v3298_v35 = vld [vmem:[%s4333_s28 + $0x50] sm:$0x1]  ;;  %v3200_v61 = vld [vmem:[%s4333_s28 + $0x44] sm:$0x1] }
  0x81   : > { %2554 = vmatprep.mubr.bf16.mxu0 %v3252_v13  ;;  %v3212_v6 = vcombine.low %v873_v0, %v883_v1  ;;  %v885_v13 = vshrl.u32 %v3195_v54, 16  ;;  %v1377_v18 = vor.u32 %v1376_v9, %v1372_v8  ;;  %v904_v20 = vshll.u32 %v3197_v4, 16  ;;  %v3234_v4 = vld [vmem:[%s4333_s28 + $0x4c] sm:$0xf]  ;;  %v3235_v9 = vld [vmem:[%s4333_s28 + $0x50] sm:$0x1] }
  0x82   : > { %3798 = vmatpush3.bf16.msra.mxu0 %v4648_v59  ;;  %2651 = vmatprep.mubr.bf16.mxu1 %v3310_v56  ;;  %v890_v24 = vrot.slane %v888_v14, 5  ;;  %v896_v25 = vrot.slane %v894_v16, 5  ;;  %v3246_v26 = vrot.slane %v3230_v10, 9  ;;  %v900_v30 = vrot.slane %v898_v19, 4  ;;  %v3299_v14 = vld [vmem:[%s4333_s28 + $0x54] sm:$0xf] }
  0x83   : > { %3834 = vmatpush3.bf16.msra.mxu1 %v4648_v59  ;;  %3799 = vmatprep.subr.bf16.mxu0 %v4667_v15  ;;  %v1119_v59 = vsel %vm4347_vm4, %v1117_v53, %v1118_v45  ;;  %v887_v23 = vrot.slane %v885_v13, 4  ;;  %v1378_v29 = vrot.slane %v1377_v18, 4  ;;  %v906_v31 = vrot.slane %v904_v20, 5  ;;  %v3300_v19 = vld [vmem:[%s4333_s28 + $0x58] sm:$0xf] }
  0x84   : > { %3827 = vmatprep.subr.bf16.mxu1 %v4667_v15  ;;  %v3253_v2 = vcombine.low %v1116_v52, %v1119_v59  ;;  %v1122_v34 = vrot.slane %v3231_v12, 5  ;;  %v1125_v36 = vrot.slane %v3232_v17, 5  ;;  %v1385_v38 = vshrl.u32 %v3296_v21, 16 }
  0x85   : > { %v891_v32 = vor.u32 %v890_v24, %v887_v23  ;;  %v1383_v39 = vsel %vm4356_vm5, %v1378_v29, %v1382_v11  ;;  %v1388_v41 = vshll.u32 %v3296_v21, 16  ;;  %v1398_v55 = vshrl.u32 %v3297_v27, 16  ;;  %v3301_v24 = vld [vmem:[%s4333_s28 + $0x5c] sm:$0x1] }
  0x86   : > { %3800 = vmatpush3.bf16.msra.mxu0 %v4667_v15  ;;  %2652 = vmatmul.mubr.bf16.gmra.mrb[40].mxu1 %v4002_v40  ;;  %v901_v40 = vor.u32 %v900_v30, %v896_v25  ;;  %v1123_v47 = vsel %vm4347_vm4, %v3246_v26, %v1122_v34  ;;  %v1124_v48 = vrot.slane %v1122_v34, 4  ;;  %v1387_v50 = vrot.slane %v1385_v38, 4 }
  0x87   : > { %3835 = vmatpush3.bf16.msra.mxu1 %v4667_v15  ;;  %3801 = vmatprep.subr.bf16.mxu0 %v4009_v42  ;;  %v1368_v15 = vrot.slane %v1367_v7, 4  ;;  %v892_v45 = vrot.slane %v891_v32, 4  ;;  %v1390_v52 = vrot.slane %v1388_v41, 5  ;;  %v1404_v56 = vshll.u32 %v3298_v35, 16  ;;  %v4006_v32 = vld [vmem:[%s4333_s28 + $0x48] sm:$0xff]  }
  0x88   : > { %3828 = vmatprep.subr.bf16.mxu1 %v4009_v42  ;;  %2555 = vmatmul.mubr.bf16.gmra.mrb[40].mxu0 %v3212_v6  ;;  %v902_v49 = vrot.slane %v901_v40, 4  ;;  %v1126_v54 = vsel %vm4347_vm4, %v1124_v48, %v1125_v36  ;;  %v909_v62 = vshrl.u32 %v3198_v43, 16  ;;  %v1400_v1 = vrot.slane %v1398_v55, 4  ;;  %v3202_v40 = vld [vmem:[%s4333_s28 + $0x4c] sm:$0xf] }
  0x89   : > { %2562 = vmatprep.mubr.bf16.mxu0 %v3253_v2  ;;  %v1373_v28 = vsel %vm4356_vm5, %v1368_v15, %v1372_v8  ;;  %v897_v37 = vsel %vm4356_vm5, %v892_v45, %v896_v25  ;;  %v3254_v60 = vcombine.low %v1123_v47, %v1126_v54  ;;  %v1391_v59 = vor.u32 %v1390_v52, %v1387_v50  ;;  %v3201_v25 = vld [vmem:[%s4333_s28 + $0x48] sm:$0xf]  ;;  %v3236_v55 = vld [vmem:[%s4333_s28 + $0x54] sm:$0xe] }
  0x8a   : > { %3802 = vmatpush3.bf16.msra.mxu0 %v4009_v42  ;;  %v3311_v44 = vcombine.low %v1373_v28, %v1383_v39  ;;  %v907_v58 = vsel %vm4356_vm5, %v902_v49, %v906_v31  ;;  %v1406_v2 = vrot.slane %v1404_v56, 5  ;;  %v912_v3 = vshll.u32 %v3198_v43, 16  ;;  %v3203_v49 = vld [vmem:[%s4333_s28 + $0x50] sm:$0x1]  ;;  %v3237_v56 = vld [vmem:[%s4333_s28 + $0x58] sm:$0xf] }
  0x8b   : > { %3836 = vmatpush3.bf16.msra.mxu1 %v4009_v42  ;;  %3803 = vmatprep.subr.bf16.mxu0 %v4011_v5  ;;  %v1394_v42 = vshll.u32 %v3297_v27, 16  ;;  %v3213_v0 = vcombine.low %v897_v37, %v907_v58  ;;  %v911_v6 = vrot.slane %v909_v62, 4  ;;  %v918_v7 = vshll.u32 %v3199_v57, 16 }
  0x8c   : > { %3829 = vmatprep.subr.bf16.mxu1 %v4011_v5  ;;  %2659 = vmatprep.mubr.bf16.mxu1 %v3311_v44  ;;  %v922_v8 = vshrl.u32 %v3199_v57, 16  ;;  %v914_v12 = vrot.slane %v912_v3, 5  ;;  %v928_v11 = vshll.u32 %v3200_v61, 16  ;;  %v3247_v13 = vrot.slane %v3233_v63, 9  ;;  %v3238_v61 = vld [vmem:[%s4333_s28 + $0x5c] sm:$0x1] }
  0x8d   : > { %v1396_v53 = vrot.slane %v1394_v42, 5  ;;  %v920_v17 = vrot.slane %v918_v7, 5  ;;  %v1129_v18 = vrot.slane %v3234_v4, 5  ;;  %v1132_v23 = vrot.slane %v3235_v9, 5  ;;  %v3303_v7 = vld [vmem:[%s4333_s28 + $0x64] sm:$0xf] }
  0x8e   : > { %3804 = vmatpush3.bf16.msra.mxu0 %v4011_v5  ;;  %2660 = vmatmul.mubr.bf16.gmra.mrb[44].mxu1 %v4004_v33  ;;  %v924_v15 = vrot.slane %v922_v8, 4  ;;  %v915_v21 = vor.u32 %v914_v12, %v911_v6  ;;  %v1409_v29 = vshrl.u32 %v3299_v14, 16  ;;  %v1412_v33 = vshll.u32 %v3299_v14, 16 }
  0x8f   : > { %3837 = vmatpush3.bf16.msra.mxu1 %v4011_v5  ;;  %3805 = vmatprep.subr.bf16.mxu0 %v4013_v22  ;;  %v1392_v5 = vrot.slane %v1391_v59, 4  ;;  %v1401_v10 = vor.u32 %v1400_v1, %v1396_v53  ;;  %v1130_v27 = vsel %vm4347_vm4, %v3247_v13, %v1129_v18  ;;  %v1131_v28 = vrot.slane %v1129_v18, 4 }
  0x90   : > { %3830 = vmatprep.subr.bf16.mxu1 %v4013_v22  ;;  %2563 = vmatmul.mubr.bf16.gmra.mrb[44].mxu0 %v3213_v0  ;;  %v925_v26 = vor.u32 %v924_v15, %v920_v17  ;;  %v916_v31 = vrot.slane %v915_v21, 4  ;;  %v1418_v34 = vshll.u32 %v3300_v19, 16  ;;  %v1411_v39 = vrot.slane %v1409_v29, 4  ;;  %v4008_v15 = vld [vmem:[%s4333_s28 + $0x54] sm:$0xff]  }
  0x91   : > { %2570 = vmatprep.mubr.bf16.mxu0 %v3254_v60  ;;  %v1397_v16 = vsel %vm4356_vm5, %v1392_v5, %v1396_v53  ;;  %v1402_v20 = vrot.slane %v1401_v10, 4  ;;  %v1133_v38 = vsel %vm4347_vm4, %v1131_v28, %v1132_v23  ;;  %v1414_v43 = vrot.slane %v1412_v33, 5 }
  0x92   : > { %3806 = vmatpush3.bf16.msra.mxu0 %v4013_v22  ;;  %v926_v35 = vrot.slane %v925_v26, 4  ;;  %v921_v41 = vsel %vm4356_vm5, %v916_v31, %v920_v17  ;;  %v3255_v42 = vcombine.low %v1130_v27, %v1133_v38  ;;  %v1420_v44 = vrot.slane %v1418_v34, 5  ;;  %v3204_v26 = vld [vmem:[%s4333_s28 + $0x54] sm:$0xf]  ;;  %v3205_v31 = vld [vmem:[%s4333_s28 + $0x58] sm:$0xf] }
  0x93   : > { %3838 = vmatpush3.bf16.msra.mxu1 %v4013_v22  ;;  %v930_v22 = vrot.slane %v928_v11, 5  ;;  %v1407_v30 = vsel %vm4356_vm5, %v1402_v20, %v1406_v2  ;;  %v1422_v47 = vshrl.u32 %v3300_v19, 16  ;;  %v1428_v48 = vshll.u32 %v3301_v24, 16  ;;  %v3302_v2 = vld [vmem:[%s4333_s28 + $0x60] sm:$0xf] }
  0x94   : > { %v3312_v36 = vcombine.low %v1397_v16, %v1407_v30  ;;  %v933_v50 = vshrl.u32 %v3201_v25, 16  ;;  %v1415_v53 = vor.u32 %v1414_v43, %v1411_v39  ;;  %v936_v37 = vshll.u32 %v3201_v25, 16  ;;  %v3304_v24 = vld [vmem:[%s4333_s28 + $0x68] sm:$0x1] }
  0x95   : > { %v931_v45 = vsel %vm4356_vm5, %v926_v35, %v930_v22  ;;  %v942_v54 = vshll.u32 %v3202_v40, 16  ;;  %v1424_v57 = vrot.slane %v1422_v47, 4  ;;  %v1430_v58 = vrot.slane %v1428_v48, 5  ;;  %v3206_v35 = vld [vmem:[%s4333_s28 + $0x5c] sm:$0x1] }
  0x96   : > { %2667 = vmatprep.mubr.bf16.mxu1 %v3312_v36  ;;  %v3214_v52 = vcombine.low %v921_v41, %v931_v45  ;;  %v935_v60 = vrot.slane %v933_v50, 4  ;;  %v946_v59 = vshrl.u32 %v3202_v40, 16  ;;  %v1416_v62 = vrot.slane %v1415_v53, 4  ;;  %v3240_v48 = vld [vmem:[%s4333_s28 + $0x64] sm:$0xf] }
  0x97   : > { %2668 = vmatmul.mubr.bf16.gmra.mrb[48].mxu1 %v4006_v32  ;;  %v938_v63 = vrot.slane %v936_v37, 5  ;;  %v944_v0 = vrot.slane %v942_v54, 5  ;;  %v952_v1 = vshll.u32 %v3203_v49, 16  ;;  %v1425_v3 = vor.u32 %v1424_v57, %v1420_v44  ;;  %v3241_v49 = vld [vmem:[%s4333_s28 + $0x68] sm:$0x1] }
  0x98   : > { %2571 = vmatmul.mubr.bf16.gmra.mrb[48].mxu0 %v3214_v52  ;;  %v948_v4 = vrot.slane %v946_v59, 4  ;;  %v3248_v5 = vrot.slane %v3236_v55, 9  ;;  %v1136_v6 = vrot.slane %v3237_v56, 5  ;;  %v1421_v8 = vsel %vm4356_vm5, %v1416_v62, %v1420_v44  ;;  %v3305_v54 = vld [vmem:[%s4333_s28 + $0x6c] sm:$0xf] }
  0x99   : > { %2578 = vmatprep.mubr.bf16.mxu0 %v3255_v42  ;;  %v939_v9 = vor.u32 %v938_v63, %v935_v60  ;;  %v954_v10 = vrot.slane %v952_v1, 5  ;;  %v1139_v12 = vrot.slane %v3238_v61, 5  ;;  %v1426_v11 = vrot.slane %v1425_v3, 4  ;;  %v3239_v42 = vld [vmem:[%s4333_s28 + $0x60] sm:$0xe] }
  0x9a   : > { %v949_v13 = vor.u32 %v948_v4, %v944_v0  ;;  %v1137_v14 = vsel %vm4347_vm4, %v3248_v5, %v1136_v6  ;;  %v1138_v16 = vrot.slane %v1136_v6, 4  ;;  %v1433_v18 = vshrl.u32 %v3302_v2, 16  ;;  %v3306_v55 = vld [vmem:[%s4333_s28 + $0x70] sm:$0xf]  ;;  %v4010_v3 = vld [vmem:[%s4333_s28 + $0x60] sm:$0xff]  }
  0x9b   : > { %v940_v17 = vrot.slane %v939_v9, 4  ;;  %v1436_v19 = vshll.u32 %v3302_v2, 16  ;;  %v1442_v20 = vshll.u32 %v3303_v7, 16  ;;  %v1431_v21 = vsel %vm4356_vm5, %v1426_v11, %v1430_v58  ;;  %v3307_v5 = vld [vmem:[%s4333_s28 + $0x74] sm:$0x1] }
  0x9c   : > { %v950_v22 = vrot.slane %v949_v13, 4  ;;  %v1140_v23 = vsel %vm4347_vm4, %v1138_v16, %v1139_v12  ;;  %v1446_v25 = vshrl.u32 %v3303_v7, 16  ;;  %v3313_v27 = vcombine.low %v1421_v8, %v1431_v21 }
  0x9d   : > { %v945_v28 = vsel %vm4356_vm5, %v940_v17, %v944_v0  ;;  %v3256_v29 = vcombine.low %v1137_v14, %v1140_v23  ;;  %v1435_v30 = vrot.slane %v1433_v18, 4  ;;  %v1438_v33 = vrot.slane %v1436_v19, 5  ;;  %v3207_v18 = vld [vmem:[%s4333_s28 + $0x60] sm:$0xf]  ;;  %v3208_v19 = vld [vmem:[%s4333_s28 + $0x64] sm:$0xf] }
  0x9e   : > { %v955_v32 = vsel %vm4356_vm5, %v950_v22, %v954_v10  ;;  %v1444_v34 = vrot.slane %v1442_v20, 5  ;;  %v1448_v36 = vrot.slane %v1446_v25, 4  ;;  %2675 = vmatprep.mubr.bf16.mxu1 %v3313_v27  ;;  %v1452_v39 = vshll.u32 %v3304_v24, 16  ;;  %v3209_v24 = vld [vmem:[%s4333_s28 + $0x68] sm:$0x1] }
  0x9f   : > { %v3215_v38 = vcombine.low %v945_v28, %v955_v32  ;;  %v957_v40 = vshrl.u32 %v3204_v26, 16  ;;  %v960_v41 = vshll.u32 %v3204_v26, 16  ;;  %2676 = vmatmul.mubr.bf16.gmra.mrb[52].mxu1 %v4008_v15  ;;  %v1439_v43 = vor.u32 %v1438_v33, %v1435_v30  ;;  %v3316_v25 = vld [vmem:[%s4333_s28 + $0x18] sm:$0xe]  ;;  %v3317_v30 = vld [vmem:[%s4333_s28 + $0x1c] sm:$0xf] }
  0xa0   : > { %v1449_v44 = vor.u32 %v1448_v36, %v1444_v34  ;;  %v966_v45 = vshll.u32 %v3205_v31, 16  ;;  %v970_v47 = vshrl.u32 %v3205_v31, 16  ;;  %v1454_v50 = vrot.slane %v1452_v39, 5  ;;  %v3318_v36 = vld [vmem:[%s4333_s28 + $0x20] sm:$0x1] }
  0xa1   : > { %2579 = vmatmul.mubr.bf16.gmra.mrb[52].mxu0 %v3215_v38  ;;  %v959_v52 = vrot.slane %v957_v40, 4  ;;  %v962_v53 = vrot.slane %v960_v41, 5  ;;  %v976_v37 = vshll.u32 %v3206_v35, 16  ;;  %v1440_v56 = vrot.slane %v1439_v43, 4  ;;  %v3328_v41 = vld [vmem:[%s4333_s28 + $0x48] sm:$0xe] }
  0xa2   : > { %2586 = vmatprep.mubr.bf16.mxu0 %v3256_v29  ;;  %v1450_v57 = vrot.slane %v1449_v44, 4  ;;  %v968_v58 = vrot.slane %v966_v45, 5  ;;  %v972_v60 = vrot.slane %v970_v47, 4  ;;  %v3249_v62 = vrot.slane %v3239_v42, 9  ;;  %v3329_v47 = vld [vmem:[%s4333_s28 + $0x4c] sm:$0xf] }
  0xa3   : > { %v963_v59 = vor.u32 %v962_v53, %v959_v52  ;;  %v978_v61 = vrot.slane %v976_v37, 5  ;;  %v1143_v63 = vrot.slane %v3240_v48, 5  ;;  %v1445_v0 = vsel %vm4356_vm5, %v1440_v56, %v1444_v34  ;;  %v3330_v53 = vld [vmem:[%s4333_s28 + $0x50] sm:$0x1] }
  0xa4   : > { %v1455_v1 = vsel %vm4356_vm5, %v1450_v57, %v1454_v50  ;;  %v973_v2 = vor.u32 %v972_v60, %v968_v58  ;;  %v1146_v4 = vrot.slane %v3241_v49, 5  ;;  %v1457_v12 = vshrl.u32 %v3305_v54, 16  ;;  %v3319_v57 = vld [vmem:[%s4333_s28 + $0x24] sm:$0xe] }
  0xa5   : > { %v3314_v6 = vcombine.low %v1445_v0, %v1455_v1  ;;  %v964_v7 = vrot.slane %v963_v59, 4  ;;  %v1144_v8 = vsel %vm4347_vm4, %v3249_v62, %v1143_v63  ;;  %v1145_v9 = vrot.slane %v1143_v63, 4  ;;  %v3321_v0 = vld [vmem:[%s4333_s28 + $0x2c] sm:$0x1]  ;;  %v3331_v1 = vld [vmem:[%s4333_s28 + $0x54] sm:$0xe] }
  0xa6   : > { %v974_v10 = vrot.slane %v973_v2, 4  ;;  %v1460_v11 = vshll.u32 %v3305_v54, 16  ;;  %v1466_v13 = vshll.u32 %v3306_v55, 16  ;;  %v1470_v17 = vshrl.u32 %v3306_v55, 16 }
  0xa7   : > { %2683 = vmatprep.mubr.bf16.mxu1 %v3314_v6  ;;  %v969_v14 = vsel %vm4356_vm5, %v964_v7, %v968_v58  ;;  %v1147_v16 = vsel %vm4347_vm4, %v1145_v9, %v1146_v4  ;;  %v1476_v15 = vshll.u32 %v3307_v5, 16  ;;  %v1459_v22 = vrot.slane %v1457_v12, 4  ;;  %v3320_v58 = vld [vmem:[%s4333_s28 + $0x28] sm:$0xf]  ;;  %v3332_v6 = vld [vmem:[%s4333_s28 + $0x58] sm:$0xf] }
  0xa8   : > { %v979_v20 = vsel %vm4356_vm5, %v974_v10, %v978_v61  ;;  %2684 = vmatmul.mubr.bf16.gmra.mrb[56].mxu1 %v4010_v3  ;;  %v3257_v21 = vcombine.low %v1144_v8, %v1147_v16  ;;  %v1462_v23 = vrot.slane %v1460_v11, 5  ;;  %v1468_v27 = vrot.slane %v1466_v13, 5  ;;  %v4012_v61 = vld [vmem:[%s4333_s28 + $0x6c] sm:$0xff]   ;;  %v3333_v12 = vld [vmem:[%s4333_s28 + $0x5c] sm:$0x1] }
  0xa9   : > { %v3216_v26 = vcombine.low %v969_v14, %v979_v20  ;;  %v1472_v28 = vrot.slane %v1470_v17, 4  ;;  %v1478_v29 = vrot.slane %v1476_v15, 5  ;;  %v981_v32 = vshrl.u32 %v3207_v18, 16  ;;  %v3322_v17 = vld [vmem:[%s4333_s28 + $0x30] sm:$0xe] }
  0xaa   : > { %v1463_v31 = vor.u32 %v1462_v23, %v1459_v22  ;;  %v984_v33 = vshll.u32 %v3207_v18, 16  ;;  %v990_v34 = vshll.u32 %v3208_v19, 16  ;;  %v994_v38 = vshrl.u32 %v3208_v19, 16  ;;  %v3323_v15 = vld [vmem:[%s4333_s28 + $0x34] sm:$0xf] }
  0xab   : > { %2587 = vmatmul.mubr.bf16.gmra.mrb[56].mxu0 %v3216_v26  ;;  %v1473_v35 = vor.u32 %v1472_v28, %v1468_v27  ;;  %v1000_v39 = vshll.u32 %v3209_v24, 16  ;;  %v3340_v40 = vrot.slane %v3316_v25, 9  ;;  %v983_v43 = vrot.slane %v981_v32, 4  ;;  %v3324_v22 = vld [vmem:[%s4333_s28 + $0x38] sm:$0x1] }
  0xac   : > { %2594 = vmatprep.mubr.bf16.mxu0 %v3257_v21  ;;  %v1464_v42 = vrot.slane %v1463_v31, 4  ;;  %v986_v44 = vrot.slane %v984_v33, 5  ;;  %v992_v45 = vrot.slane %v990_v34, 5  ;;  %v996_v49 = vrot.slane %v994_v38, 4  ;;  %v3334_v23 = vld [vmem:[%s4333_s28 + $0x60] sm:$0xe] }
  0xad   : > { %v1474_v48 = vrot.slane %v1473_v35, 4  ;;  %v1002_v50 = vrot.slane %v1000_v39, 5  ;;  %v1570_v52 = vrot.slane %v3317_v30, 5  ;;  %v1573_v55 = vrot.slane %v3318_v36, 5  ;;  %v3335_v28 = vld [vmem:[%s4333_s28 + $0x64] sm:$0xf] }
  0xae   : > { %v1469_v37 = vsel %vm4356_vm5, %v1464_v42, %v1468_v27  ;;  %v987_v54 = vor.u32 %v986_v44, %v983_v43  ;;  %v3344_v56 = vrot.slane %v3328_v41, 9  ;;  %v997_v59 = vor.u32 %v996_v49, %v992_v45  ;;  %v3325_v33 = vld [vmem:[%s4333_s28 + $0x3c] sm:$0xe]  ;;  %v3326_v38 = vld [vmem:[%s4333_s28 + $0x40] sm:$0xf] }
  0xaf   : > { %v1479_v60 = vsel %vm4356_vm5, %v1474_v48, %v1478_v29  ;;  %v1571_v62 = vsel %vm4347_vm4, %v3340_v40, %v1570_v52  ;;  %v1572_v63 = vrot.slane %v1570_v52, 4  ;;  %v1598_v4 = vrot.slane %v3329_v47, 5  ;;  %v3337_v39 = vld [vmem:[%s4333_s28 + $0x6c] sm:$0xe]  ;;  %v3338_v44 = vld [vmem:[%s4333_s28 + $0x70] sm:$0xf] }
  0xb0   : > { %v3315_v2 = vcombine.low %v1469_v37, %v1479_v60  ;;  %v988_v3 = vrot.slane %v987_v54, 4  ;;  %v1601_v5 = vrot.slane %v3330_v53, 5  ;;  %v998_v7 = vrot.slane %v997_v59, 4 }
  0xb1   : > { %v1574_v8 = vsel %vm4347_vm4, %v1572_v63, %v1573_v55  ;;  %v3341_v9 = vrot.slane %v3319_v57, 9  ;;  %v1577_v10 = vrot.slane %v3320_v58, 5  ;;  %v1599_v14 = vsel %vm4347_vm4, %v3344_v56, %v1598_v4  ;;  %v3339_v55 = vld [vmem:[%s4333_s28 + $0x74] sm:$0x1] }
  0xb2   : > { %2691 = vmatprep.mubr.bf16.mxu1 %v3315_v2  ;;  %v993_v11 = vsel %vm4356_vm5, %v988_v3, %v992_v45  ;;  %v3348_v13 = vcombine.low %v1571_v62, %v1574_v8  ;;  %v1600_v16 = vrot.slane %v1598_v4, 4  ;;  %v1003_v18 = vsel %vm4356_vm5, %v998_v7, %v1002_v50  ;;  %v3327_v50 = vld [vmem:[%s4333_s28 + $0x44] sm:$0x1]  ;;  %s4928_s28 = sand.u32 1, %s4116_s13  }
  0xb3   : > { %2692 = vmatmul.mubr.bf16.gmra.mrb[60].mxu1 %v4012_v61  ;;  %v1578_v19 = vsel %vm4347_vm4, %v3341_v9, %v1577_v10  ;;  %v1579_v20 = vrot.slane %v1577_v10, 4  ;;  %v1580_v21 = vrot.slane %v3321_v0, 5  ;;  %v3217_v24 = vcombine.low %v993_v11, %v1003_v18  ;;  %s3122_s7 = sshll.u32 %s4928_s28, 6  ;;  %s2938_s24 = scalar_lea.sflag [#allocation4], %s4928_s28 }
  0xb4   : > { %v1602_v25 = vsel %vm4347_vm4, %v1600_v16, %v1601_v5  ;;  %v3345_v26 = vrot.slane %v3331_v1, 9  ;;  %v1605_v27 = vrot.slane %v3332_v6, 5  ;;  %v1608_v31 = vrot.slane %v3333_v12, 5  ;;  %s4948_s8 = scalar_lea.vmem [#allocation3], %s3122_s7  ;;  %s4018_s7 = sshll.u32 %s4142_s6, 4  ;;  %s4019_s7 = int_to_ptr.vmem [resolvable:$false] %s4018_s7 }
  0xb5   : > { %v3352_v29 = vcombine.low %v1599_v14, %v1602_v25  ;;  %v1581_v30 = vsel %vm4347_vm4, %v1579_v20, %v1580_v21  ;;  %v3342_v32 = vrot.slane %v3322_v17, 9  ;;  %2595 = vmatmul.mubr.bf16.gmra.mrb[60].mxu0 %v3217_v24  ;;  %v1584_v35 = vrot.slane %v3323_v15, 5  ;;  %s2960_s27 = sshll.u32 %s4948_s8, 4  ;;  %s4020_s10 = scalar_lea.vmem %s4019_s7, 2048  ;;  %s4985_s27 = int_to_ptr.vmem [resolvable:$true] %s2960_s27 }
  0xb6   : > { %v1606_v34 = vsel %vm4347_vm4, %v3345_v26, %v1605_v27  ;;  %v1607_v36 = vrot.slane %v1605_v27, 4  ;;  %3807 = vmatprep.mubr.bf16.mxu0 %v3348_v13  ;;  %v1587_v40 = vrot.slane %v3324_v22, 5  ;;  %v3346_v41 = vrot.slane %v3334_v23, 9  ;;  %s4014_s29 = scalar_lea.vmem %s4985_s27, 1024  ;;  %p4021_p2 = scmp.lt.s32.totalorder %s4985_s27, %s4019_s7 }
  0xb7   : > { %3815 = vmatprep.mubr.bf16.mxu1 %v3352_v29  ;;  %v1612_v42 = vrot.slane %v3335_v28, 5  ;;  %v1615_v43 = vrot.slane %v3336_v51, 5  ;;  %v3349_v45 = vcombine.low %v1578_v19, %v1581_v30  ;;  %v1585_v48 = vsel %vm4347_vm4, %v3342_v32, %v1584_v35  ;;  %p4015_p13 = scmp.ne.s32.totalorder %s4985_s27, %s4014_s29  ;;  %p4022_p4 = scmp.lt.s32.totalorder %s4020_s10, %s4014_s29 }
  0xb8   : > { %v1609_v47 = vsel %vm4347_vm4, %v1607_v36, %v1608_v31  ;;  %v1586_v49 = vrot.slane %v1584_v35, 4  ;;  %v1591_v54 = vrot.slane %v3326_v38, 5  ;;  %v3343_v57 = vrot.slane %v3325_v33, 9 }
  0xb9   : > { %v3353_v52 = vcombine.low %v1606_v34, %v1609_v47  ;;  %v1613_v53 = vsel %vm4347_vm4, %v3346_v41, %v1612_v42  ;;  %v1614_v37 = vrot.slane %v1612_v42, 4  ;;  %v3347_v58 = vrot.slane %v3337_v39, 9  ;;  %p4016_p0 = pnand %p4015_p13, %p4217_p3  ;;  %p4023_p5 = por %p4022_p4, %p4021_p2 }
  0xba   : > { %v1588_v56 = vsel %vm4347_vm4, %v1586_v49, %v1587_v40  ;;  %v1619_v60 = vrot.slane %v3338_v44, 5  ;;  %v1593_v62 = vrot.slane %v1591_v54, 4  ;;  %v1594_v63 = vrot.slane %v3327_v50, 5 }
  0xbb   : > { %3816 = vmatmul.mubr.bf16.vlgmr.msra.gmra.mrb[64].mxu1 %v3353_v52  ;;  %v3350_v59 = vcombine.low %v1585_v48, %v1588_v56  ;;  %v1616_v61 = vsel %vm4347_vm4, %v1614_v37, %v1615_v43  ;;  %v1622_v3 = vrot.slane %v3339_v55, 5  ;;  %v1592_v5 = vsel %vm4347_vm4, %v3343_v57, %v1591_v54  ;;  %p4017_p1 = pneg %p4016_p0 }
  0xbc   : > { %v3354_v0 = vcombine.low %v1613_v53, %v1616_v61  ;;  %v1620_v1 = vsel %vm4347_vm4, %v3347_v58, %v1619_v60  ;;  %v1621_v2 = vrot.slane %v1619_v60, 4  ;;  %v1595_v6 = vsel %vm4347_vm4, %v1593_v62, %v1594_v63 }
  0xbd   : > { %3808 = vmatmul.mubr.bf16.vlgmr.msra.gmra.mrb[64].mxu0 %v3349_v45  ;;  %v3351_v8 = vcombine.low %v1592_v5, %v1595_v6  ;;  %p4024_p6 = pnand %p4023_p5, %p4017_p1 }
  0xbe   : > { %3819 = vmatprep.mubr.bf16.mxu1 %v3354_v0  ;;  %v1623_v4 = vsel %vm4347_vm4, %v1621_v2, %v1622_v3  ;;  %3811 = vmatprep.mubr.bf16.mxu0 %v3350_v59 }
  0xbf   : > { %v3355_v7 = vcombine.low %v1620_v1, %v1623_v4 }
  0xc3   : > { %3820 = vmatmul.mubr.bf16.gmra.mrb[68].mxu1 %v3355_v7 }
  0xc5   : > { %3812 = vmatmul.mubr.bf16.gmra.mrb[68].mxu0 %v3351_v8 }
 0x108   : > { %v3535_v10 = vpop.f32.mrb[0].mxu0 }
 0x109   : > { %v3599_v9 = vpop.f32.mrb[0].mxu1  ;;  %v3536_v11 = vpop.f32.mrb[1].mxu0 }
 0x10a   : > { %v3600_v12 = vpop.f32.mrb[1].mxu1  ;;  %v3537_v16 = vadd.f32 %v3536_v11, %v3535_v10  ;;  %v3538_v17 = vpop.f32.mrb[2].mxu0 }
 0x10b   : > { %v3601_v13 = vadd.f32 %v3600_v12, %v3599_v9  ;;  %v3602_v14 = vpop.f32.mrb[2].mxu1  ;;  %v3539_v18 = vpop.f32.mrb[3].mxu0 }
 0x10c   : > { %v3603_v15 = vpop.f32.mrb[3].mxu1  ;;  %v3540_v21 = vadd.f32 %v3539_v18, %v3538_v17 }
 0x10d   : > { %v3604_v19 = vadd.f32 %v3603_v15, %v3602_v14  ;;  %v4863_v20 = vadd.f32 %v3601_v13, %v3537_v16 }
 0x10f   : > { %v4865_v46 = vadd.f32 %v3604_v19, %v3540_v21 }
 0x110   : > { %v3541_v23 = vpop.f32.mrb[4].mxu0 }
 0x111   : > { %v3605_v22 = vpop.f32.mrb[4].mxu1  ;;  %v3542_v25 = vpop.f32.mrb[5].mxu0 }
 0x112   : > { %v3606_v24 = vpop.f32.mrb[5].mxu1  ;;  %v3543_v28 = vadd.f32 %v3542_v25, %v3541_v23  ;;  %v3544_v51 = vpop.f32.mrb[6].mxu0 }
 0x113   : > { %v3607_v26 = vadd.f32 %v3606_v24, %v3605_v22  ;;  %v3608_v27 = vpop.f32.mrb[6].mxu1  ;;  %v3545_v30 = vpop.f32.mrb[7].mxu0 }
 0x114   : > { %v3609_v29 = vpop.f32.mrb[7].mxu1  ;;  %v3546_v33 = vadd.f32 %v3545_v30, %v3544_v51 }
 0x115   : > { %v3610_v31 = vadd.f32 %v3609_v29, %v3608_v27  ;;  %v4867_v32 = vadd.f32 %v3607_v26, %v3543_v28 }
 0x117   : > { %v4869_v34 = vadd.f32 %v3610_v31, %v3546_v33 }
 0x118   : > { %v3547_v35 = vpop.f32.mrb[8].mxu0 }
 0x119   : > { %v3611_v36 = vpop.f32.mrb[8].mxu1  ;;  %v3548_v39 = vpop.f32.mrb[9].mxu0 }
 0x11a   : > { %v3612_v38 = vpop.f32.mrb[9].mxu1  ;;  %v3549_v42 = vadd.f32 %v3548_v39, %v3547_v35  ;;  %v3550_v43 = vpop.f32.mrb[10].mxu0 }
 0x11b   : > { %v3613_v40 = vadd.f32 %v3612_v38, %v3611_v36  ;;  %v3614_v41 = vpop.f32.mrb[10].mxu1  ;;  %v3551_v45 = vpop.f32.mrb[11].mxu0 }
 0x11c   : > { %v3615_v44 = vpop.f32.mrb[11].mxu1  ;;  %v3552_v49 = vadd.f32 %v3551_v45, %v3550_v43 }
 0x11d   : > { %v3616_v47 = vadd.f32 %v3615_v44, %v3614_v41  ;;  %v4871_v48 = vadd.f32 %v3613_v40, %v3549_v42 }
 0x11f   : > { %v4873_v50 = vadd.f32 %v3616_v47, %v3552_v49 }
 0x120   : > { %v3553_v53 = vpop.f32.mrb[12].mxu0 }
 0x121   : > { %v3617_v52 = vpop.f32.mrb[12].mxu1  ;;  %v3554_v54 = vpop.f32.mrb[13].mxu0 }
 0x122   : > { %v3618_v37 = vpop.f32.mrb[13].mxu1  ;;  %v3555_v57 = vadd.f32 %v3554_v54, %v3553_v53  ;;  %v3556_v58 = vpop.f32.mrb[14].mxu0 }
 0x123   : > { %v3619_v55 = vadd.f32 %v3618_v37, %v3617_v52  ;;  %v3620_v56 = vpop.f32.mrb[14].mxu1  ;;  %v3557_v59 = vpop.f32.mrb[15].mxu0 }
 0x124   : > { %v3621_v60 = vpop.f32.mrb[15].mxu1  ;;  %v3558_v63 = vadd.f32 %v3557_v59, %v3556_v58 }
 0x125   : > { %v3622_v61 = vadd.f32 %v3621_v60, %v3620_v56  ;;  %v4875_v62 = vadd.f32 %v3619_v55, %v3555_v57 }
 0x127   : > { %v4877_v0 = vadd.f32 %v3622_v61, %v3558_v63 }
 0x128   : > { %v3559_v2 = vpop.f32.mrb[16].mxu0 }
 0x129   : > { %v3623_v1 = vpop.f32.mrb[16].mxu1  ;;  %v3560_v4 = vpop.f32.mrb[17].mxu0 }
 0x12a   : > { %v3624_v3 = vpop.f32.mrb[17].mxu1  ;;  %v3561_v7 = vadd.f32 %v3560_v4, %v3559_v2  ;;  %v3562_v8 = vpop.f32.mrb[18].mxu0 }
 0x12b   : > { %v3625_v5 = vadd.f32 %v3624_v3, %v3623_v1  ;;  %v3626_v6 = vpop.f32.mrb[18].mxu1  ;;  %v3563_v10 = vpop.f32.mrb[19].mxu0 }
 0x12c   : > { %v3627_v9 = vpop.f32.mrb[19].mxu1  ;;  %v3564_v13 = vadd.f32 %v3563_v10, %v3562_v8 }
 0x12d   : > { %v3628_v12 = vadd.f32 %v3627_v9, %v3626_v6  ;;  %v4879_v11 = vadd.f32 %v3625_v5, %v3561_v7 }
 0x12f   : > { %v4881_v14 = vadd.f32 %v3628_v12, %v3564_v13 }
 0x130   : > { %v3565_v17 = vpop.f32.mrb[20].mxu0 }
 0x131   : > { %v3629_v16 = vpop.f32.mrb[20].mxu1  ;;  %v3566_v18 = vpop.f32.mrb[21].mxu0 }
 0x132   : > { %v3630_v15 = vpop.f32.mrb[21].mxu1  ;;  %v3567_v22 = vadd.f32 %v3566_v18, %v3565_v17  ;;  %v3568_v23 = vpop.f32.mrb[22].mxu0 }
 0x133   : > { %v3631_v19 = vadd.f32 %v3630_v15, %v3629_v16  ;;  %v3632_v21 = vpop.f32.mrb[22].mxu1  ;;  %v3569_v25 = vpop.f32.mrb[23].mxu0 }
 0x134   : > { %v3633_v24 = vpop.f32.mrb[23].mxu1  ;;  %v3570_v28 = vadd.f32 %v3569_v25, %v3568_v23 }
 0x135   : > { %v3634_v26 = vadd.f32 %v3633_v24, %v3632_v21  ;;  %v4883_v27 = vadd.f32 %v3631_v19, %v3567_v22 }
 0x137   : > { %v4885_v51 = vadd.f32 %v3634_v26, %v3570_v28 }
 0x138   : > { %v3571_v30 = vpop.f32.mrb[24].mxu0 }
 0x139   : > { %v3635_v29 = vpop.f32.mrb[24].mxu1  ;;  %v3572_v33 = vpop.f32.mrb[25].mxu0 }
 0x13a   : > { %v3636_v31 = vpop.f32.mrb[25].mxu1  ;;  %v3573_v38 = vadd.f32 %v3572_v33, %v3571_v30  ;;  %v3574_v39 = vpop.f32.mrb[26].mxu0 }
 0x13b   : > { %v3637_v36 = vadd.f32 %v3636_v31, %v3635_v29  ;;  %v3638_v35 = vpop.f32.mrb[26].mxu1  ;;  %v3575_v41 = vpop.f32.mrb[27].mxu0 }
 0x13c   : > { %v3639_v40 = vpop.f32.mrb[27].mxu1  ;;  %v3576_v44 = vadd.f32 %v3575_v41, %v3574_v39 }
 0x13d   : > { %v3640_v42 = vadd.f32 %v3639_v40, %v3638_v35  ;;  %v4887_v43 = vadd.f32 %v3637_v36, %v3573_v38 }
 0x13f   : > { %v4889_v45 = vadd.f32 %v3640_v42, %v3576_v44 }
 0x140   : > { %v3577_v49 = vpop.f32.mrb[28].mxu0 }
 0x141   : > { %v3641_v47 = vpop.f32.mrb[28].mxu1  ;;  %v3578_v53 = vpop.f32.mrb[29].mxu0 }
 0x142   : > { %v3642_v52 = vpop.f32.mrb[29].mxu1  ;;  %v3579_v55 = vadd.f32 %v3578_v53, %v3577_v49  ;;  %v3580_v56 = vpop.f32.mrb[30].mxu0 }
 0x143   : > { %v3643_v37 = vadd.f32 %v3642_v52, %v3641_v47  ;;  %v3644_v54 = vpop.f32.mrb[30].mxu1  ;;  %v3581_v58 = vpop.f32.mrb[31].mxu0 }
 0x144   : > { %v3645_v57 = vpop.f32.mrb[31].mxu1  ;;  %v3582_v61 = vadd.f32 %v3581_v58, %v3580_v56 }
 0x145   : > { %v3646_v60 = vadd.f32 %v3645_v57, %v3644_v54  ;;  %v4891_v59 = vadd.f32 %v3643_v37, %v3579_v55 }
 0x147   : > { %v4893_v63 = vadd.f32 %v3646_v60, %v3582_v61 }
 0x148   : > { %v3663_v6 = vpop.f32.mrb[32].mxu0 }
 0x149   : > { %v3727_v1 = vpop.f32.mrb[32].mxu1  ;;  %v3664_v8 = vpop.f32.mrb[33].mxu0 }
 0x14a   : > { %v3728_v2 = vpop.f32.mrb[33].mxu1  ;;  %v3665_v9 = vadd.f32 %v3664_v8, %v3663_v6  ;;  %v3666_v10 = vpop.f32.mrb[34].mxu0 }
 0x14b   : > { %v3729_v3 = vadd.f32 %v3728_v2, %v3727_v1  ;;  %v3730_v4 = vpop.f32.mrb[34].mxu1  ;;  %v3667_v12 = vpop.f32.mrb[35].mxu0 }
 0x14c   : > { %v3731_v5 = vpop.f32.mrb[35].mxu1  ;;  %v2541_v13 = vadd.f32 %v3665_v9, %v4863_v20  ;;  %v3668_v16 = vadd.f32 %v3667_v12, %v3666_v10 }
 0x14d   : > { %v3732_v7 = vadd.f32 %v3731_v5, %v3730_v4 }
 0x14e   : > { %v2544_v17 = vadd.f32 %v3668_v16, %v4865_v46  ;;  %v4897_v15 = vadd.f32 %v3729_v3, %v2541_v13 }
 0x150   : > { %v4899_v21 = vadd.f32 %v3732_v7, %v2544_v17 }
 0x151   : > { %v3733_v18 = vpop.f32.mrb[36].mxu1 }
 0x152   : > { %v3734_v19 = vpop.f32.mrb[37].mxu1  ;;  %v3669_v24 = vpop.f32.mrb[36].mxu0 }
 0x153   : > { %v3735_v22 = vadd.f32 %v3734_v19, %v3733_v18  ;;  %v3736_v23 = vpop.f32.mrb[38].mxu1  ;;  %v3670_v26 = vpop.f32.mrb[37].mxu0 }
 0x154   : > { %v3737_v25 = vpop.f32.mrb[39].mxu1  ;;  %v3671_v29 = vadd.f32 %v3670_v26, %v3669_v24  ;;  %v3672_v30 = vpop.f32.mrb[38].mxu0 }
 0x155   : > { %v3738_v28 = vadd.f32 %v3737_v25, %v3736_v23  ;;  %v3673_v31 = vpop.f32.mrb[39].mxu0 }
 0x156   : > { %v2549_v20 = vadd.f32 %v3671_v29, %v4867_v32  ;;  %v3674_v33 = vadd.f32 %v3673_v31, %v3672_v30 }
 0x158   : > { %v2552_v46 = vadd.f32 %v3674_v33, %v4869_v34  ;;  %v4903_v36 = vadd.f32 %v3735_v22, %v2549_v20 }
 0x159   : > { %v3739_v35 = vpop.f32.mrb[40].mxu1 }
 0x15a   : > { %v4905_v38 = vadd.f32 %v3738_v28, %v2552_v46  ;;  %v3740_v39 = vpop.f32.mrb[41].mxu1 }
 0x15b   : > { %v3675_v40 = vpop.f32.mrb[40].mxu0  ;;  %v3741_v41 = vadd.f32 %v3740_v39, %v3739_v35  ;;  %v3742_v42 = vpop.f32.mrb[42].mxu1 }
 0x15c   : > { %v3676_v44 = vpop.f32.mrb[41].mxu0  ;;  %v3743_v47 = vpop.f32.mrb[43].mxu1 }
 0x15d   : > { %v3677_v49 = vadd.f32 %v3676_v44, %v3675_v40  ;;  %v3678_v52 = vpop.f32.mrb[42].mxu0  ;;  %v3744_v53 = vadd.f32 %v3743_v47, %v3742_v42 }
 0x15e   : > { %v3679_v37 = vpop.f32.mrb[43].mxu0 }
 0x15f   : > { %v2557_v32 = vadd.f32 %v3677_v49, %v4871_v48  ;;  %v3680_v54 = vadd.f32 %v3679_v37, %v3678_v52 }
 0x161   : > { %v2560_v34 = vadd.f32 %v3680_v54, %v4873_v50  ;;  %v4909_v55 = vadd.f32 %v3741_v41, %v2557_v32  ;;  %v3745_v56 = vpop.f32.mrb[44].mxu1 }
 0x162   : > { %v3746_v58 = vpop.f32.mrb[45].mxu1 }
 0x163   : > { %v4911_v57 = vadd.f32 %v3744_v53, %v2560_v34  ;;  %v3747_v60 = vadd.f32 %v3746_v58, %v3745_v56  ;;  %v3748_v61 = vpop.f32.mrb[46].mxu1  ;;  %v3681_v1 = vpop.f32.mrb[44].mxu0 }
 0x164   : > { %v3749_v2 = vpop.f32.mrb[47].mxu1  ;;  %v3682_v3 = vpop.f32.mrb[45].mxu0 }
 0x165   : > { %v3750_v4 = vadd.f32 %v3749_v2, %v3748_v61  ;;  %v3683_v5 = vadd.f32 %v3682_v3, %v3681_v1  ;;  %v3684_v6 = vpop.f32.mrb[46].mxu0 }
 0x166   : > { %v3685_v7 = vpop.f32.mrb[47].mxu0 }
 0x167   : > { %v2565_v48 = vadd.f32 %v3683_v5, %v4875_v62  ;;  %v3686_v8 = vadd.f32 %v3685_v7, %v3684_v6 }
 0x169   : > { %v2568_v50 = vadd.f32 %v3686_v8, %v4877_v0  ;;  %v4915_v9 = vadd.f32 %v3747_v60, %v2565_v48 }
 0x16a   : > { %v3751_v10 = vpop.f32.mrb[48].mxu1 }
 0x16b   : > { %v4917_v12 = vadd.f32 %v3750_v4, %v2568_v50  ;;  %v3752_v13 = vpop.f32.mrb[49].mxu1  ;;  %v3687_v16 = vpop.f32.mrb[48].mxu0 }
 0x16c   : > { %v3753_v17 = vadd.f32 %v3752_v13, %v3751_v10  ;;  %v3754_v18 = vpop.f32.mrb[50].mxu1  ;;  %v3688_v19 = vpop.f32.mrb[49].mxu0 }
 0x16d   : > { %v3755_v22 = vpop.f32.mrb[51].mxu1  ;;  %v3689_v23 = vadd.f32 %v3688_v19, %v3687_v16  ;;  %v3690_v24 = vpop.f32.mrb[50].mxu0 }
 0x16e   : > { %v3756_v25 = vadd.f32 %v3755_v22, %v3754_v18  ;;  %v3691_v26 = vpop.f32.mrb[51].mxu0 }
 0x16f   : > { %v2573_v62 = vadd.f32 %v3689_v23, %v4879_v11  ;;  %v3692_v28 = vadd.f32 %v3691_v26, %v3690_v24 }
 0x171   : > { %v2576_v0 = vadd.f32 %v3692_v28, %v4881_v14  ;;  %v2670_v29 = vadd.f32 %v3753_v17, %v2573_v62 }
 0x172   : > { %v3757_v31 = vpop.f32.mrb[52].mxu1 }
 0x173   : > { %v2673_v30 = vadd.f32 %v3756_v25, %v2576_v0  ;;  %v3758_v33 = vpop.f32.mrb[53].mxu1 }
 0x174   : > { %v3693_v20 = vpop.f32.mrb[52].mxu0  ;;  %v3759_v35 = vadd.f32 %v3758_v33, %v3757_v31  ;;  %v3760_v39 = vpop.f32.mrb[54].mxu1 }
 0x175   : > { %v3694_v46 = vpop.f32.mrb[53].mxu0  ;;  %v3761_v42 = vpop.f32.mrb[55].mxu1 }
 0x176   : > { %v3695_v40 = vadd.f32 %v3694_v46, %v3693_v20  ;;  %v3696_v41 = vpop.f32.mrb[54].mxu0  ;;  %v3762_v47 = vadd.f32 %v3761_v42, %v3760_v39 }
 0x177   : > { %v3697_v44 = vpop.f32.mrb[55].mxu0 }
 0x178   : > { %v2581_v49 = vadd.f32 %v3695_v40, %v4883_v27  ;;  %v3698_v52 = vadd.f32 %v3697_v44, %v3696_v41 }
 0x17a   : > { %v2584_v11 = vadd.f32 %v3698_v52, %v4885_v51  ;;  %v2678_v53 = vadd.f32 %v3759_v35, %v2581_v49 }
 0x17b   : > { %v3763_v14 = vpop.f32.mrb[56].mxu1 }
 0x17c   : > { %v3764_v37 = vpop.f32.mrb[57].mxu1  ;;  %v2681_v32 = vadd.f32 %v3762_v47, %v2584_v11 }
 0x17d   : > { %v3765_v54 = vadd.f32 %v3764_v37, %v3763_v14  ;;  %v3766_v34 = vpop.f32.mrb[58].mxu1 }
 0x17e   : > { %v3699_v56 = vpop.f32.mrb[56].mxu0  ;;  %v3767_v58 = vpop.f32.mrb[59].mxu1 }
 0x17f   : > { %v3700_v60 = vpop.f32.mrb[57].mxu0  ;;  %v3768_v61 = vadd.f32 %v3767_v58, %v3766_v34 }
 0x180   : > { %v3701_v1 = vadd.f32 %v3700_v60, %v3699_v56  ;;  %v3702_v2 = vpop.f32.mrb[58].mxu0 }
 0x181   : > { %v3703_v3 = vpop.f32.mrb[59].mxu0 }
 0x182   : > { %v2589_v4 = vadd.f32 %v3701_v1, %v4887_v43  ;;  %v3704_v27 = vadd.f32 %v3703_v3, %v3702_v2 }
 0x184   : > { %v2592_v5 = vadd.f32 %v3704_v27, %v4889_v45  ;;  %v2686_v51 = vadd.f32 %v3765_v54, %v2589_v4 }
 0x186   : > { %v3769_v6 = vpop.f32.mrb[60].mxu1  ;;  %v4925_v7 = vadd.f32 %v3768_v61, %v2592_v5 }
 0x187   : > { %v3770_v48 = vpop.f32.mrb[61].mxu1 }
 0x188   : > { %v3771_v8 = vadd.f32 %v3770_v48, %v3769_v6  ;;  %v3772_v50 = vpop.f32.mrb[62].mxu1  ;;  %v3705_v10 = vpop.f32.mrb[60].mxu0 }
 0x189   : > { %v3773_v13 = vpop.f32.mrb[63].mxu1  ;;  %v3706_v16 = vpop.f32.mrb[61].mxu0 }
 0x18a   : > { %v3774_v17 = vadd.f32 %v3773_v13, %v3772_v50  ;;  %v3707_v18 = vadd.f32 %v3706_v16, %v3705_v10  ;;  %v3708_v19 = vpop.f32.mrb[62].mxu0 }
 0x18b   : > { %v3709_v22 = vpop.f32.mrb[63].mxu0 }
 0x18c   : > { %v2597_v43 = vadd.f32 %v3707_v18, %v4891_v59  ;;  %v3710_v45 = vadd.f32 %v3709_v22, %v3708_v19 }
 0x18e   : > { %v3817_v23 = vpop.f32.mrb[64].mxu1  ;;  %v2600_v24 = vadd.f32 %v3710_v45, %v4893_v63  ;;  %v2694_v62 = vadd.f32 %v3771_v8, %v2597_v43 }
 0x18f   : > { %v4932_v25 = vadd.f32 %v3817_v23, %v2678_v53  ;;  %v2766_v26 = vpop.f32.mrb[65].mxu1 }
 0x190   : > { %v4935_v28 = vadd.f32 %v2766_v26, %v2670_v29  ;;  %v3818_v0 = vpop.f32.mrb[66].mxu1  ;;  %v3809_v31 = vpop.f32.mrb[64].mxu0  ;;  %v2697_v46 = vadd.f32 %v3774_v17, %v2600_v24 }
 0x191   : > { %v4937_v20 = vadd.f32 %v3818_v0, %v2681_v32  ;;  %v2769_v33 = vpop.f32.mrb[67].mxu1  ;;  %v2743_v59 = vadd.f32 %v3809_v31, %v4903_v36  ;;  %v2734_v35 = vpop.f32.mrb[65].mxu0 }
 0x192   : > { %v4940_v39 = vadd.f32 %v2769_v33, %v2673_v30  ;;  %v2735_v63 = vadd.f32 %v2734_v35, %v4897_v15  ;;  %v3810_v40 = vpop.f32.mrb[66].mxu0 }
 0x193   : > { %v3500_v29 = vpack.c.bf16 %v4937_v20, %v4932_v25  ;;  %v2746_v41 = vadd.f32 %v3810_v40, %v4905_v38  ;;  %v2737_v42 = vpop.f32.mrb[67].mxu0 }
 0x194   : > { %v3495_v44 = vpack.c.bf16 %v4940_v39, %v4935_v28  ;;  %v2738_v36 = vadd.f32 %v2737_v42, %v4899_v21  ;;  %v2899_v15 = vmul.f32 %v2735_v63, %v2735_v63  ;;  %v2901_v21 = vmul.f32 %v2743_v59, %v2743_v59 }
 0x195   : > { %3516 = vst [vmem:[%s4948_s8 + $0x28] sm:$0xff] %v3500_v29   ;;  %v3480_v30 = vpack.c.bf16 %v2746_v41, %v2743_v59  ;;  %v2902_v60 = vmul.f32 %v2746_v41, %v2746_v41 }
 0x196   : > { %3515 = vst [vmem:[%s4948_s8 + $0x20] sm:$0xff] %v3495_v44   ;;  %v3821_v47 = vpop.f32.mrb[68].mxu1  ;;  %v3475_v38 = vpack.c.bf16 %v2738_v36, %v2735_v63  ;;  %v2877_v49 = vadd.f32 %v2738_v36, %v2735_v63  ;;  %v2900_v52 = vmul.f32 %v2738_v36, %v2738_v36 }
 0x197   : > { %v4955_v11 = vadd.f32 %v3821_v47, %v2694_v62  ;;  %v2782_v53 = vpop.f32.mrb[69].mxu1  ;;  %3512 = vst [vmem:[%s4948_s8 + $0x8] sm:$0xff] %v3480_v30  }
 0x198   : > { %v4958_v14 = vadd.f32 %v2782_v53, %v2686_v51  ;;  %v3822_v37 = vpop.f32.mrb[70].mxu1  ;;  %3476 = vst [vmem:[%s4948_s8] sm:$0xff] %v3475_v38   ;;  %v2878_v32 = vadd.f32 %v2877_v49, %v2743_v59  ;;  %v2915_v54 = vadd.f32 %v2900_v52, %v2899_v15  ;;  %v3813_v34 = vpop.f32.mrb[68].mxu0 }
 0x199   : > { %v4963_v56 = vadd.f32 %v3822_v37, %v2697_v46  ;;  %v2785_v58 = vpop.f32.mrb[71].mxu1  ;;  %v2759_v61 = vadd.f32 %v3813_v34, %v4915_v9  ;;  %v2750_v1 = vpop.f32.mrb[69].mxu0 }
 0x19a   : > { %v4967_v2 = vadd.f32 %v2785_v58, %v4925_v7  ;;  %v2916_v3 = vadd.f32 %v2915_v54, %v2901_v21  ;;  %v2751_v4 = vadd.f32 %v2750_v1, %v4909_v55  ;;  %v2879_v27 = vadd.f32 %v2878_v32, %v2746_v41  ;;  %v3814_v5 = vpop.f32.mrb[70].mxu0 }
 0x19b   : > { %v3510_v51 = vpack.c.bf16 %v4963_v56, %v4955_v11  ;;  %v2762_v6 = vadd.f32 %v3814_v5, %v4917_v12  ;;  %v2753_v9 = vpop.f32.mrb[71].mxu0  ;;  %v2905_v18 = vmul.f32 %v2759_v61, %v2759_v61 }
 0x19c   : > { %v3505_v48 = vpack.c.bf16 %v4967_v2, %v4958_v14  ;;  %v2880_v7 = vadd.f32 %v2879_v27, %v2751_v4  ;;  %v2903_v8 = vmul.f32 %v2751_v4, %v2751_v4  ;;  %v2917_v50 = vadd.f32 %v2916_v3, %v2902_v60 }
 0x19d   : > { %3518 = vst [vmem:[%s4948_s8 + $0x38] sm:$0xff] %v3510_v51   ;;  %v2754_v55 = vadd.f32 %v2753_v9, %v4911_v57  ;;  %v3490_v10 = vpack.c.bf16 %v2762_v6, %v2759_v61 }
 0x19e   : > { %3517 = vst [vmem:[%s4948_s8 + $0x30] sm:$0xff] %v3505_v48   ;;  %v2918_v12 = vadd.f32 %v2917_v50, %v2903_v8 }
 0x19f   : > { %v3485_v13 = vpack.c.bf16 %v2754_v55, %v2751_v4  ;;  %v2881_v16 = vadd.f32 %v2880_v7, %v2754_v55  ;;  %v2904_v17 = vmul.f32 %v2754_v55, %v2754_v55  ;;  %3514 = vst [vmem:[%s4948_s8 + $0x18] sm:$0xff] %v3490_v10  }
 0x1a1   : > { %3513 = vst [vmem:[%s4948_s8 + $0x10] sm:$0xff] %v3485_v13   ;;  %v2882_v57 = vadd.f32 %v2881_v16, %v2759_v61  ;;  %v2919_v19 = vadd.f32 %v2918_v12, %v2904_v17 }
 0x1a2   : > { %4027 = shalt.err (!%p4024_p6)
}
 0x1a3   : > { %s4028_s8 = scalar_lea.hbm %s4983_s5, 1024  ;;  %s4032_s21 = scalar_lea.hbm %s5099_s2, 4096 }
 0x1a4   : > { %p4029_p7 = scmp.ne.s32.totalorder %s4983_s5, %s4028_s8  ;;  %p4033_p11 = scmp.lt.u32.totalorder %s4983_s5, %s5099_s2 }
 0x1a5   : > { %p4034_p12 = scmp.lt.u32.totalorder %s4032_s21, %s4028_s8  ;;  %p4036_p0 = scmp.lt.u32.totalorder %s4028_s8, %s4983_s5 }
 0x1a6   : > { %p4030_p9 = pnand %p4029_p7, %p4217_p3 }
 0x1a7   : > { %p4035_p13 = por %p4034_p12, %p4033_p11 }
 0x1a8   : > { %p4031_p10 = pneg %p4030_p9 }
 0x1a9   : > { %p4037_p1 = por %p4036_p0, %p4035_p13 }
 0x1ab   : > { %p4038_p2 = pnand %p4037_p1, %p4031_p10 }
 0x1ad   : > { %4041 = shalt.err (!%p4038_p2)
}
 0x1ae   : > { %s4143_s29 = smov 64   ;;  %s4144_s6 = smov 4   ;;  %v2906_v22 = vmul.f32 %v2762_v6, %v2762_v6  ;;  %v2883_v43 = vadd.f32 %v2882_v57, %v2762_v6  ;;  %v2920_v45 = vadd.f32 %v2919_v19, %v2905_v18  ;;  %v2907_v23 = vmul.f32 %v4935_v28, %v4935_v28 }
 0x1af   : > { %3840 = dma.vmem_to_hbm [thread:$0]  (%p4217_p3), %s4985_s27, 1024, %s4983_s5, %s2938_s24, %s4143_s29, %s4143_s29, %s4144_s6   ;;  %v2908_v62 = vmul.f32 %v4940_v39, %v4940_v39  ;;  %v2909_v33 = vmul.f32 %v4932_v25, %v4932_v25  ;;  %v2910_v35 = vmul.f32 %v4937_v20, %v4937_v20  ;;  %v2913_v44 = vmul.f32 %v4955_v11, %v4955_v11 }
 0x1b0   : > { %v2884_v24 = vadd.f32 %v2883_v43, %v4935_v28  ;;  %v2921_v26 = vadd.f32 %v2920_v45, %v2906_v22  ;;  %v2911_v28 = vmul.f32 %v4958_v14, %v4958_v14  ;;  %v2914_v15 = vmul.f32 %v4963_v56, %v4963_v56  ;;  %s3123_s27 = sshll.u32 %s4928_s28, 1  ;;  %s3450_s5 = sshll.u32 %s4128_s16, 1 }
 0x1b1   : > { %s2975_s24 = sadd.s32 %s4124_s15, %s3450_s5  ;;  %s214_s10 = scalar_lea.vmem [#allocation5], %s3123_s27 }
 0x1b2   : > { %v2922_v0 = vadd.f32 %v2921_v26, %v2907_v23  ;;  %v2885_v31 = vadd.f32 %v2884_v24, %v4940_v39  ;;  %s3451_s7 = sshll.u32 %s2975_s24, 5  ;;  %s2979_s8 = sshll.u32 %s214_s10, 4  ;;  %s5045_s8 = int_to_ptr.vmem [resolvable:$true] %s2979_s8 }
 0x1b3   : > { %s5043_s16 = scalar_lea.hbm %s5100_s3, %s3451_s7  ;;  %s2943_s15 = scalar_lea.sflag [#allocation6], %s4928_s28 }
 0x1b4   : > { %v2886_v46 = vadd.f32 %v2885_v31, %v4932_v25  ;;  %v2923_v59 = vadd.f32 %v2922_v0, %v2908_v62  ;;  %v2912_v25 = vmul.f32 %v4967_v2, %v4967_v2  ;;  %s4042_s21 = scalar_lea.vmem %s5045_s8, 32  ;;  %s4145_s9 = smov [#allocation5]  }
 0x1b5   : > { %p4043_p4 = scmp.ne.s32.totalorder %s5045_s8, %s4042_s21  ;;  %s4046_s4 = sshll.u32 %s4145_s9, 4  ;;  %s4047_s4 = int_to_ptr.vmem [resolvable:$false] %s4046_s4 }
 0x1b6   : > { %v2887_v63 = vadd.f32 %v2886_v46, %v4937_v20  ;;  %v2924_v40 = vadd.f32 %v2923_v59, %v2909_v33  ;;  %s4048_s29 = scalar_lea.vmem %s4047_s4, 64  ;;  %p4049_p7 = scmp.lt.s32.totalorder %s5045_s8, %s4047_s4 }
 0x1b7   : > { %p4044_p5 = pnand %p4043_p4, %p4217_p3  ;;  %p4050_p9 = scmp.lt.s32.totalorder %s4048_s29, %s4042_s21 }
 0x1b8   : > { %v2888_v29 = vadd.f32 %v2887_v63, %v4958_v14  ;;  %v2925_v39 = vadd.f32 %v2924_v40, %v2910_v35 }
 0x1b9   : > { %p4045_p6 = pneg %p4044_p5  ;;  %p4051_p10 = por %p4050_p9, %p4049_p7 }
 0x1ba   : > { %v2889_v41 = vadd.f32 %v2888_v29, %v4967_v2  ;;  %v2926_v42 = vadd.f32 %v2925_v39, %v2911_v28 }
 0x1bb   : > { %p4052_p11 = pnand %p4051_p10, %p4045_p6 }
 0x1bc   : > { %v2890_v20 = vadd.f32 %v2889_v41, %v4955_v11  ;;  %v2927_v36 = vadd.f32 %v2926_v42, %v2912_v25 }
 0x1be   : > { %v2891_v30 = vadd.f32 %v2890_v20, %v4963_v56  ;;  %v2928_v47 = vadd.f32 %v2927_v36, %v2913_v44 }
 0x1c0   : > { %v2892_v38 = vrot.slane %v2891_v30, 4  ;;  %v2929_v49 = vadd.f32 %v2928_v47, %v2914_v15 }
 0x1c2   : > { %v2893_v52 = vadd.f32 %v2892_v38, %v2891_v30  ;;  %v2930_v53 = vrot.slane %v2929_v49, 4 }
 0x1c4   : > { %v2894_v14 = vrot.slane %v2893_v52, 2  ;;  %v2931_v37 = vadd.f32 %v2930_v53, %v2929_v49 }
 0x1c6   : > { %v2895_v21 = vadd.f32 %v2894_v14, %v2893_v52  ;;  %v2932_v32 = vrot.slane %v2931_v37, 2 }
 0x1c8   : > { %v2896_v11 = vrot.slane %v2895_v21, 1  ;;  %v2933_v54 = vadd.f32 %v2932_v32, %v2931_v37 }
 0x1ca   : > { %v2897_v34 = vadd.f32 %v2896_v11, %v2895_v21  ;;  %v2934_v56 = vrot.slane %v2933_v54, 1 }
 0x1cc   : > { %2898 = vst [vmem:[%s214_s10] sm:$0x1] %v2897_v34  ;;  %v2935_v58 = vadd.f32 %v2934_v56, %v2933_v54 }
 0x1ce   : > { %2936 = vst [vmem:[%s214_s10 + $0x1] sm:$0x1] %v2935_v58 }
 0x1cf   : > { %4055 = shalt.err (!%p4052_p11)
}
 0x1d0   : > { %s4056_s28 = scalar_lea.hbm %s5043_s16, 32  ;;  %s4060_s5 = scalar_lea.hbm %s5100_s3, 128 }
 0x1d1   : > { %p4057_p12 = scmp.ne.s32.totalorder %s5043_s16, %s4056_s28  ;;  %p4061_p1 = scmp.lt.u32.totalorder %s5043_s16, %s5100_s3 }
 0x1d2   : > { %p4062_p2 = scmp.lt.u32.totalorder %s4060_s5, %s4056_s28  ;;  %p4064_p5 = scmp.lt.u32.totalorder %s4056_s28, %s5043_s16 }
 0x1d3   : > { %p4058_p13 = pnand %p4057_p12, %p4217_p3 }
 0x1d4   : > { %p4063_p4 = por %p4062_p2, %p4061_p1 }
 0x1d5   : > { %p4059_p0 = pneg %p4058_p13 }
 0x1d6   : > { %p4065_p6 = por %p4064_p5, %p4063_p4 }
 0x1d8   : > { %p4066_p7 = pnand %p4065_p6, %p4059_p0 }
 0x1da   : > { %4069 = shalt.err (!%p4066_p7)
}
 0x1db   : > { %3841 = dma.vmem_to_hbm [thread:$0]  (%p4217_p3), %s5045_s8, 32, %s5043_s16, %s2943_s15  }
 0x1dc PF: > { %p3851_p9 = scmp.ge.s32.totalorder %s4140_s19, 2  ;;  %s2991_s10 = sand.u32 1, %s4112_s12  }
 0x1dd   : > { %s2992_s11 = scalar_lea.sflag [#allocation4], %s2991_s10 }
 0x1de   : > { %p3845_p10 = pnand %p3851_p9, %p4226_p8 }
 0x1e0   : > { %4103 = dma.done.wait (!%p3845_p10), %s2992_s11, 1024  }
 0x1e1   : > { %4105 = vsyncadd (!%p3845_p10), %s2992_s11, 4294966272  ;;  %s3001_s20 = scalar_lea.sflag [#allocation6], %s2991_s10 }
 0x1e2   : > { %4107 = dma.done.wait (!%p3845_p10), %s3001_s20, 32  }
 0x1e3   : > { %4109 = vsyncadd (!%p3845_p10), %s3001_s20, 4294967264  ;;  %s20_s19 = sadd.s32 1, %s4140_s19   ;;  %s5107_s12 = smov %s4116_s13 }
 0x1e4   : > { %p17_p11 = scmp.ge.s32.totalorder %s20_s19, 6   ;;  %s5108_s13 = smov %s4120_s14 }
 0x1e5   : > { %s5109_s14 = smov %s4235_s30  ;;  %s5110_s15 = smov %s4132_s17 }
 0x1e6   : > { %s5111_s16 = smov %s4136_s18  ;;  %s5112_s17 = smov %s5115_s22 }
 0x1e7   : > { %s5113_s18 = smov %s5119_s23  ;;  %19 = sbr.rel (!%p17_p11) target bundleno = 7 (0x7), region = 90 }
 0x1ee   :  { %3006 = vsyncpa [#allocation4], 1 }
 0x1ef   :  { %3008 = vsyncpa [#allocation4 + $0x1], 1 }
 0x1f0   :  { %3009 = vsyncpa [#allocation6], 1 }
 0x1f1   :  { %3011 = vsyncpa [#allocation6 + $0x1], 1 }

</bundles_post_ra>
